<compile_context>
chip_gen: v7x
topology: tpu7x:2x2x1
jax: 0.10.0
libtpu: 0.0.40
codegen_flags: <defaults>
</compile_context>

<pallas_src>
import math

import jax
import jax.numpy as jnp
from jax.experimental import pallas as pl
from jax.experimental.pallas import tpu as pltpu  # noqa: F401  (kept for TPU-specific knobs)

# ---------------- problem sizes (small, consistent with the module) ----------------
B = 2          # batch
SQ = 8         # query sequence length (x / pos_embed)
SK = 8         # context sequence length
D = 32         # model dim
H = 4          # num_heads
HD = D // H    # head dim
N = B * H      # batched head instances
MLP_RATIO = 3.0
DH = int(D * MLP_RATIO)   # 96
LN_EPS = 1e-5


# ---------------------------- fused Pallas kernel ----------------------------
def _layernorm(h, gamma, beta):
    mu = jnp.mean(h, axis=-1, keepdims=True)
    var = jnp.mean((h - mu) * (h - mu), axis=-1, keepdims=True)
    return (h - mu) * jax.lax.rsqrt(var + LN_EPS) * gamma + beta


def _mblock_kernel(x_ref, ctx_ref, pos_ref,
                   wq_ref, bq_ref, wkv_ref, bkv_ref, wo_ref,
                   w1_ref, b1_ref, w2_ref, vecs_ref,
                   o_ref):
    """Whole MBlock forward for all B batch elements in one invocation (no grid)."""
    # ---- build (N, S, D) head-batched activations (leading-dim broadcast/concat only) ----
    q_rows, c_rows = [], []
    for bb in range(B):                                   # static, B = 2
        q_in = x_ref[bb] + pos_ref[bb]                    # (SQ, D)
        q_rows.append(jnp.broadcast_to(q_in[None], (H, SQ, D)))
        c_rows.append(jnp.broadcast_to(ctx_ref[bb][None], (H, SK, D)))
    q_in_n = jnp.concatenate(q_rows, axis=0)              # (N, SQ, D)
    ctx_n = jnp.concatenate(c_rows, axis=0)               # (N, SK, D)

    # ---- per-head projections (softmax scale already folded into wq / bq) ----
    q = jnp.einsum('nqd,ndf->nqf', q_in_n, wq_ref[...],
                   preferred_element_type=jnp.float32) + bq_ref[...]        # (N, SQ, HD)
    kv = jnp.einsum('nkd,ndf->nkf', ctx_n, wkv_ref[...],
                    preferred_element_type=jnp.float32) + bkv_ref[...]      # (N, SK, 2*HD)
    k = kv[:, :, :HD]
    v = kv[:, :, HD:]

    # ---- scaled-dot-product attention, batched over all B*H heads ----
    s = jnp.einsum('nqd,nkd->nqk', q, k, preferred_element_type=jnp.float32)  # (N, SQ, SK)
    s = s - jnp.max(s, axis=-1, keepdims=True)
    p = jnp.exp(s)
    p = p * pl.reciprocal(jnp.sum(p, axis=-1, keepdims=True), approx=False)
    attn = jnp.einsum('nqk,nkd->nqd', p, v, preferred_element_type=jnp.float32)  # (N, SQ, HD)

    # per-head slice of Wo: summing head contributions == concat(heads) @ Wo
    o_part = jnp.einsum('nqd,ndo->nqo', attn, wo_ref[...],
                        preferred_element_type=jnp.float32)                 # (N, SQ, D)

    # ---- small stacked vectors: bo, ln1_g, ln1_b, ln2_g, ln2_b, b2 ----
    bo = vecs_ref[0:1, :]
    g1 = vecs_ref[1:2, :]
    be1 = vecs_ref[2:3, :]
    g2 = vecs_ref[3:4, :]
    be2 = vecs_ref[4:5, :]
    b2 = vecs_ref[5:6, :]
    w1 = w1_ref[...]
    b1 = b1_ref[...]
    w2 = w2_ref[...]

    # ---- residual + LN1 + MLP(GELU) + residual + LN2 (tiny static loop over B) ----
    for bb in range(B):
        attn_b = o_part[bb * H]
        for hh in range(1, H):
            attn_b = attn_b + o_part[bb * H + hh]          # sum over heads  (SQ, D)
        h = x_ref[bb] + attn_b + bo                         # residual 1
        h = _layernorm(h, g1, be1)                          # norm1
        m = jnp.dot(h, w1, preferred_element_type=jnp.float32) + b1
        # exact GELU (PyTorch nn.GELU default): 0.5*x*(1+erf(x/sqrt(2)))
        m = 0.5 * m * (1.0 + jax.lax.erf(m * 0.7071067811865476))
        y = jnp.dot(m, w2, preferred_element_type=jnp.float32) + b2
        o_ref[bb] = _layernorm(h + y, g2, be2).astype(o_ref.dtype)          # norm2


# ---------------------------- wrappers ----------------------------
def prepare_params(p):
    """One-time parameter prep: head-major weights, fused K/V, folded softmax scale."""
    scale = 1.0 / math.sqrt(HD)
    wq_h = (p["wq"] * scale).reshape(D, H, HD).transpose(1, 0, 2)          # (H, D, HD)
    bq_h = (p["bq"][0] * scale).reshape(H, 1, HD)                          # (H, 1, HD)
    wk_h = p["wk"].reshape(D, H, HD).transpose(1, 0, 2)
    wv_h = p["wv"].reshape(D, H, HD).transpose(1, 0, 2)
    wkv_h = jnp.concatenate([wk_h, wv_h], axis=-1)                         # (H, D, 2HD)
    bkv_h = jnp.concatenate([p["bk"][0].reshape(H, 1, HD),
                             p["bv"][0].reshape(H, 1, HD)], axis=-1)       # (H, 1, 2HD)
    wo_h = p["wo"].reshape(H, HD, D)                                       # (H, HD, D)

    def rep(a):  # replicate head-major params over batch -> (B*H, ...)
        return jnp.broadcast_to(a[None], (B,) + a.shape).reshape((B * H,) + a.shape[1:])

    vecs = jnp.concatenate([p["bo"], p["ln1_g"], p["ln1_b"],
                            p["ln2_g"], p["ln2_b"], p["b2"]], axis=0)      # (6, D)
    return {
        "wq_n": rep(wq_h), "bq_n": rep(bq_h),
        "wkv_n": rep(wkv_h), "bkv_n": rep(bkv_h),
        "wo_n": rep(wo_h),
        "w1": p["w1"], "b1": p["b1"], "w2": p["w2"],
        "vecs": vecs,
    }


def mblock_forward(x, ctx, pos, prep):
    """Single fused pallas_call; no grid (whole problem fits one step / a few vregs)."""
    return pl.pallas_call(
        _mblock_kernel,
        out_shape=jax.ShapeDtypeStruct((B, SQ, D), jnp.float32),
    )(x, ctx, pos,
      prep["wq_n"], prep["bq_n"], prep["wkv_n"], prep["bkv_n"], prep["wo_n"],
      prep["w1"], prep["b1"], prep["w2"], prep["vecs"])


# ---------------------------- pure-JAX reference ----------------------------
def mblock_reference(x, ctx, pos, p):
    q = (x + pos) @ p["wq"] + p["bq"][0]
    k = ctx @ p["wk"] + p["bk"][0]
    v = ctx @ p["wv"] + p["bv"][0]
    q = q.reshape(B, SQ, H, HD).transpose(0, 2, 1, 3)
    k = k.reshape(B, SK, H, HD).transpose(0, 2, 1, 3)
    v = v.reshape(B, SK, H, HD).transpose(0, 2, 1, 3)
    s = jnp.einsum("bhqd,bhkd->bhqk", q, k) / math.sqrt(HD)
    p_attn = jax.nn.softmax(s, axis=-1)
    o = jnp.einsum("bhqk,bhkd->bhqd", p_attn, v).transpose(0, 2, 1, 3).reshape(B, SQ, D)
    attn_out = o @ p["wo"] + p["bo"][0]

    def ln(h, g, b):
        mu = jnp.mean(h, axis=-1, keepdims=True)
        var = jnp.mean((h - mu) ** 2, axis=-1, keepdims=True)
        return (h - mu) / jnp.sqrt(var + LN_EPS) * g[0] + b[0]

    h = ln(x + attn_out, p["ln1_g"], p["ln1_b"])
    m = jax.nn.gelu(h @ p["w1"] + p["b1"][0], approximate=False)
    y = m @ p["w2"] + p["b2"][0]
    return ln(h + y, p["ln2_g"], p["ln2_b"])


# ---------------------------- parameter init ----------------------------
def init_params(key):
    ks = jax.random.split(key, 8)
    sc = 0.1
    return {
        "wq": sc * jax.random.normal(ks[0], (D, D), jnp.float32),
        "wk": sc * jax.random.normal(ks[1], (D, D), jnp.float32),
        "wv": sc * jax.random.normal(ks[2], (D, D), jnp.float32),
        "wo": sc * jax.random.normal(ks[3], (D, D), jnp.float32),
        "bq": jnp.zeros((1, D), jnp.float32),
        "bk": jnp.zeros((1, D), jnp.float32),
        "bv": jnp.zeros((1, D), jnp.float32),
        "bo": jnp.zeros((1, D), jnp.float32),
        "ln1_g": jnp.ones((1, D), jnp.float32),
        "ln1_b": jnp.zeros((1, D), jnp.float32),
        "w1": sc * jax.random.normal(ks[4], (D, DH), jnp.float32),
        "b1": 0.01 * jnp.ones((1, DH), jnp.float32),
        "w2": sc * jax.random.normal(ks[5], (DH, D), jnp.float32),
        "b2": 0.01 * jnp.ones((1, D), jnp.float32),
        "ln2_g": jnp.ones((1, D), jnp.float32),
        "ln2_b": jnp.zeros((1, D), jnp.float32),
    }


if __name__ == "__main__":
    key = jax.random.PRNGKey(0)
    k_x, k_c, k_p, k_w = jax.random.split(key, 4)
    x = jax.random.normal(k_x, (B, SQ, D), jnp.float32)
    context = jax.random.normal(k_c, (B, SK, D), jnp.float32)
    pos_embed = jax.random.normal(k_p, (B, SQ, D), jnp.float32)
    params = init_params(k_w)

    prep = prepare_params(params)                       # one-time weight prep
    out = mblock_forward(x, context, pos_embed, prep)   # single fused kernel
    out = jax.block_until_ready(out)

    ref = mblock_reference(x, context, pos_embed, params)
    assert out.shape == (B, SQ, D)
    assert jnp.allclose(out, ref, atol=1e-4, rtol=1e-4), (
        f"max abs err {jnp.max(jnp.abs(out - ref))}")
    print("KERNEL_OK")
</pallas_src>

<mosaic_0001>
module attributes {stable_mosaic.version = 11 : i64} {
  func.func @_mblock_kernel(%arg0: memref<2x8x32xf32, #tpu.memory_space<vmem>>, %arg1: memref<2x8x32xf32, #tpu.memory_space<vmem>>, %arg2: memref<2x8x32xf32, #tpu.memory_space<vmem>>, %arg3: memref<8x32x8xf32, #tpu.memory_space<vmem>>, %arg4: memref<8x1x8xf32, #tpu.memory_space<vmem>>, %arg5: memref<8x32x16xf32, #tpu.memory_space<vmem>>, %arg6: memref<8x1x16xf32, #tpu.memory_space<vmem>>, %arg7: memref<8x8x32xf32, #tpu.memory_space<vmem>>, %arg8: memref<32x96xf32, #tpu.memory_space<vmem>>, %arg9: memref<1x96xf32, #tpu.memory_space<vmem>>, %arg10: memref<96x32xf32, #tpu.memory_space<vmem>>, %arg11: memref<6x32xf32, #tpu.memory_space<vmem>>, %arg12: memref<2x8x32xf32, #tpu.memory_space<vmem>>) attributes {dimension_semantics = [], scalar_prefetch = 0 : i64, scratch_operands = 0 : i64, tpu.core_type = #tpu.core_type<tc>} {
    %c0 = arith.constant 0 : index
    %c0_0 = arith.constant 0 : index
    %c0_1 = arith.constant 0 : index
    %0 = vector.load %arg0[%c0, %c0_0, %c0_1] : memref<2x8x32xf32, #tpu.memory_space<vmem>>, vector<1x8x32xf32>
    %1 = vector.shape_cast %0 : vector<1x8x32xf32> to vector<8x32xf32>
    %c0_2 = arith.constant 0 : index
    %c0_3 = arith.constant 0 : index
    %c0_4 = arith.constant 0 : index
    %2 = vector.load %arg2[%c0_2, %c0_3, %c0_4] : memref<2x8x32xf32, #tpu.memory_space<vmem>>, vector<1x8x32xf32>
    %3 = vector.shape_cast %2 : vector<1x8x32xf32> to vector<8x32xf32>
    %4 = arith.addf %1, %3 : vector<8x32xf32>
    %5 = vector.shape_cast %4 : vector<8x32xf32> to vector<1x8x32xf32>
    %6 = vector.shape_cast %5 : vector<1x8x32xf32> to vector<1x8x32xf32>
    %7 = vector.broadcast %6 : vector<1x8x32xf32> to vector<4x8x32xf32>
    %c0_5 = arith.constant 0 : index
    %c0_6 = arith.constant 0 : index
    %c0_7 = arith.constant 0 : index
    %8 = vector.load %arg1[%c0_5, %c0_6, %c0_7] : memref<2x8x32xf32, #tpu.memory_space<vmem>>, vector<1x8x32xf32>
    %9 = vector.shape_cast %8 : vector<1x8x32xf32> to vector<8x32xf32>
    %10 = vector.shape_cast %9 : vector<8x32xf32> to vector<1x8x32xf32>
    %11 = vector.shape_cast %10 : vector<1x8x32xf32> to vector<1x8x32xf32>
    %12 = vector.broadcast %11 : vector<1x8x32xf32> to vector<4x8x32xf32>
    %c1 = arith.constant 1 : index
    %c0_8 = arith.constant 0 : index
    %c0_9 = arith.constant 0 : index
    %13 = vector.load %arg0[%c1, %c0_8, %c0_9] : memref<2x8x32xf32, #tpu.memory_space<vmem>>, vector<1x8x32xf32>
    %14 = vector.shape_cast %13 : vector<1x8x32xf32> to vector<8x32xf32>
    %c1_10 = arith.constant 1 : index
    %c0_11 = arith.constant 0 : index
    %c0_12 = arith.constant 0 : index
    %15 = vector.load %arg2[%c1_10, %c0_11, %c0_12] : memref<2x8x32xf32, #tpu.memory_space<vmem>>, vector<1x8x32xf32>
    %16 = vector.shape_cast %15 : vector<1x8x32xf32> to vector<8x32xf32>
    %17 = arith.addf %14, %16 : vector<8x32xf32>
    %18 = vector.shape_cast %17 : vector<8x32xf32> to vector<1x8x32xf32>
    %19 = vector.shape_cast %18 : vector<1x8x32xf32> to vector<1x8x32xf32>
    %20 = vector.broadcast %19 : vector<1x8x32xf32> to vector<4x8x32xf32>
    %c1_13 = arith.constant 1 : index
    %c0_14 = arith.constant 0 : index
    %c0_15 = arith.constant 0 : index
    %21 = vector.load %arg1[%c1_13, %c0_14, %c0_15] : memref<2x8x32xf32, #tpu.memory_space<vmem>>, vector<1x8x32xf32>
    %22 = vector.shape_cast %21 : vector<1x8x32xf32> to vector<8x32xf32>
    %23 = vector.shape_cast %22 : vector<8x32xf32> to vector<1x8x32xf32>
    %24 = vector.shape_cast %23 : vector<1x8x32xf32> to vector<1x8x32xf32>
    %25 = vector.broadcast %24 : vector<1x8x32xf32> to vector<4x8x32xf32>
    %26 = tpu.concatenate %7, %20 in 0 : vector<4x8x32xf32>, vector<4x8x32xf32> -> vector<8x8x32xf32>
    %27 = tpu.concatenate %12, %25 in 0 : vector<4x8x32xf32>, vector<4x8x32xf32> -> vector<8x8x32xf32>
    %c0_16 = arith.constant 0 : index
    %c0_17 = arith.constant 0 : index
    %c0_18 = arith.constant 0 : index
    %28 = vector.load %arg3[%c0_16, %c0_17, %c0_18] : memref<8x32x8xf32, #tpu.memory_space<vmem>>, vector<8x32x8xf32>
    "tpu.trace_start"() <{level = 10 : i32, message = "nqd,ndf->nqf"}> : () -> ()
    %cst = arith.constant dense<0.000000e+00> : vector<8x8x8xf32>
    %29 = tpu.matmul %26, %28, %cst {dimension_numbers = #tpu.dot_dimension_numbers<[2], [1], [1], [2], [0, 0, 0, 1, 1, 2], [0], [0]>} : vector<8x8x32xf32>, vector<8x32x8xf32>, vector<8x8x8xf32> -> vector<8x8x8xf32>
    "tpu.trace_stop"() : () -> ()
    %c0_19 = arith.constant 0 : index
    %c0_20 = arith.constant 0 : index
    %c0_21 = arith.constant 0 : index
    %30 = vector.load %arg4[%c0_19, %c0_20, %c0_21] : memref<8x1x8xf32, #tpu.memory_space<vmem>>, vector<8x1x8xf32>
    %31 = vector.broadcast %30 : vector<8x1x8xf32> to vector<8x8x8xf32>
    %32 = arith.addf %29, %31 : vector<8x8x8xf32>
    %c0_22 = arith.constant 0 : index
    %c0_23 = arith.constant 0 : index
    %c0_24 = arith.constant 0 : index
    %33 = vector.load %arg5[%c0_22, %c0_23, %c0_24] : memref<8x32x16xf32, #tpu.memory_space<vmem>>, vector<8x32x16xf32>
    "tpu.trace_start"() <{level = 10 : i32, message = "nkd,ndf->nkf"}> : () -> ()
    %cst_25 = arith.constant dense<0.000000e+00> : vector<8x8x16xf32>
    %34 = tpu.matmul %27, %33, %cst_25 {dimension_numbers = #tpu.dot_dimension_numbers<[2], [1], [1], [2], [0, 0, 0, 1, 1, 2], [0], [0]>} : vector<8x8x32xf32>, vector<8x32x16xf32>, vector<8x8x16xf32> -> vector<8x8x16xf32>
    "tpu.trace_stop"() : () -> ()
    %c0_26 = arith.constant 0 : index
    %c0_27 = arith.constant 0 : index
    %c0_28 = arith.constant 0 : index
    %35 = vector.load %arg6[%c0_26, %c0_27, %c0_28] : memref<8x1x16xf32, #tpu.memory_space<vmem>>, vector<8x1x16xf32>
    %36 = vector.broadcast %35 : vector<8x1x16xf32> to vector<8x8x16xf32>
    %37 = arith.addf %34, %36 : vector<8x8x16xf32>
    %38 = vector.extract_strided_slice %37 {offsets = [0, 0, 0], sizes = [8, 8, 8], strides = [1, 1, 1]} : vector<8x8x16xf32> to vector<8x8x8xf32>
    %39 = vector.extract_strided_slice %37 {offsets = [0, 0, 8], sizes = [8, 8, 8], strides = [1, 1, 1]} : vector<8x8x16xf32> to vector<8x8x8xf32>
    "tpu.trace_start"() <{level = 10 : i32, message = "nqd,nkd->nqk"}> : () -> ()
    %cst_29 = arith.constant dense<0.000000e+00> : vector<8x8x8xf32>
    %40 = tpu.matmul %32, %38, %cst_29 {dimension_numbers = #tpu.dot_dimension_numbers<[2], [2], [1], [1], [0, 0, 0, 1, 1, 1], [0], [0]>} : vector<8x8x8xf32>, vector<8x8x8xf32>, vector<8x8x8xf32> -> vector<8x8x8xf32>
    "tpu.trace_stop"() : () -> ()
    %cst_30 = arith.constant dense<0xFF800000> : vector<8x8xf32>
    %41 = vector.multi_reduction <maximumf>, %40, %cst_30 [2] : vector<8x8x8xf32> to vector<8x8xf32>
    %42 = vector.shape_cast %41 : vector<8x8xf32> to vector<8x8x1xf32>
    %43 = vector.broadcast %42 : vector<8x8x1xf32> to vector<8x8x8xf32>
    %44 = arith.subf %40, %43 : vector<8x8x8xf32>
    %45 = math.exp %44 : vector<8x8x8xf32>
    %cst_31 = arith.constant dense<0.000000e+00> : vector<8x8xf32>
    %46 = vector.multi_reduction <add>, %45, %cst_31 [2] : vector<8x8x8xf32> to vector<8x8xf32>
    %47 = vector.shape_cast %46 : vector<8x8xf32> to vector<8x8x1xf32>
    %48 = tpu.reciprocal %47 : vector<8x8x1xf32> -> vector<8x8x1xf32>
    %49 = vector.broadcast %48 : vector<8x8x1xf32> to vector<8x8x8xf32>
    %50 = arith.mulf %45, %49 : vector<8x8x8xf32>
    "tpu.trace_start"() <{level = 10 : i32, message = "nqk,nkd->nqd"}> : () -> ()
    %cst_32 = arith.constant dense<0.000000e+00> : vector<8x8x8xf32>
    %51 = tpu.matmul %50, %39, %cst_32 {dimension_numbers = #tpu.dot_dimension_numbers<[2], [1], [1], [2], [0, 0, 0, 1, 1, 2], [0], [0]>} : vector<8x8x8xf32>, vector<8x8x8xf32>, vector<8x8x8xf32> -> vector<8x8x8xf32>
    "tpu.trace_stop"() : () -> ()
    %c0_33 = arith.constant 0 : index
    %c0_34 = arith.constant 0 : index
    %c0_35 = arith.constant 0 : index
    %52 = vector.load %arg7[%c0_33, %c0_34, %c0_35] : memref<8x8x32xf32, #tpu.memory_space<vmem>>, vector<8x8x32xf32>
    "tpu.trace_start"() <{level = 10 : i32, message = "nqd,ndo->nqo"}> : () -> ()
    %cst_36 = arith.constant dense<0.000000e+00> : vector<8x8x32xf32>
    %53 = tpu.matmul %51, %52, %cst_36 {dimension_numbers = #tpu.dot_dimension_numbers<[2], [1], [1], [2], [0, 0, 0, 1, 1, 2], [0], [0]>} : vector<8x8x8xf32>, vector<8x8x32xf32>, vector<8x8x32xf32> -> vector<8x8x32xf32>
    "tpu.trace_stop"() : () -> ()
    %c0_37 = arith.constant 0 : index
    %c0_38 = arith.constant 0 : index
    %54 = vector.load %arg11[%c0_37, %c0_38] : memref<6x32xf32, #tpu.memory_space<vmem>>, vector<1x32xf32>
    %c1_39 = arith.constant 1 : index
    %c0_40 = arith.constant 0 : index
    %55 = vector.load %arg11[%c1_39, %c0_40] : memref<6x32xf32, #tpu.memory_space<vmem>>, vector<1x32xf32>
    %c2 = arith.constant 2 : index
    %c0_41 = arith.constant 0 : index
    %56 = vector.load %arg11[%c2, %c0_41] : memref<6x32xf32, #tpu.memory_space<vmem>>, vector<1x32xf32>
    %c3 = arith.constant 3 : index
    %c0_42 = arith.constant 0 : index
    %57 = vector.load %arg11[%c3, %c0_42] : memref<6x32xf32, #tpu.memory_space<vmem>>, vector<1x32xf32>
    %c4 = arith.constant 4 : index
    %c0_43 = arith.constant 0 : index
    %58 = vector.load %arg11[%c4, %c0_43] : memref<6x32xf32, #tpu.memory_space<vmem>>, vector<1x32xf32>
    %c5 = arith.constant 5 : index
    %c0_44 = arith.constant 0 : index
    %59 = vector.load %arg11[%c5, %c0_44] : memref<6x32xf32, #tpu.memory_space<vmem>>, vector<1x32xf32>
    %c0_45 = arith.constant 0 : index
    %c0_46 = arith.constant 0 : index
    %60 = vector.load %arg8[%c0_45, %c0_46] : memref<32x96xf32, #tpu.memory_space<vmem>>, vector<32x96xf32>
    %c0_47 = arith.constant 0 : index
    %c0_48 = arith.constant 0 : index
    %61 = vector.load %arg9[%c0_47, %c0_48] : memref<1x96xf32, #tpu.memory_space<vmem>>, vector<1x96xf32>
    %c0_49 = arith.constant 0 : index
    %c0_50 = arith.constant 0 : index
    %62 = vector.load %arg10[%c0_49, %c0_50] : memref<96x32xf32, #tpu.memory_space<vmem>>, vector<96x32xf32>
    %63 = vector.extract_strided_slice %53 {offsets = [0, 0, 0], sizes = [1, 8, 32], strides = [1, 1, 1]} : vector<8x8x32xf32> to vector<1x8x32xf32>
    %64 = vector.shape_cast %63 : vector<1x8x32xf32> to vector<8x32xf32>
    %65 = vector.extract_strided_slice %53 {offsets = [1, 0, 0], sizes = [1, 8, 32], strides = [1, 1, 1]} : vector<8x8x32xf32> to vector<1x8x32xf32>
    %66 = vector.shape_cast %65 : vector<1x8x32xf32> to vector<8x32xf32>
    %67 = arith.addf %64, %66 : vector<8x32xf32>
    %68 = vector.extract_strided_slice %53 {offsets = [2, 0, 0], sizes = [1, 8, 32], strides = [1, 1, 1]} : vector<8x8x32xf32> to vector<1x8x32xf32>
    %69 = vector.shape_cast %68 : vector<1x8x32xf32> to vector<8x32xf32>
    %70 = arith.addf %67, %69 : vector<8x32xf32>
    %71 = vector.extract_strided_slice %53 {offsets = [3, 0, 0], sizes = [1, 8, 32], strides = [1, 1, 1]} : vector<8x8x32xf32> to vector<1x8x32xf32>
    %72 = vector.shape_cast %71 : vector<1x8x32xf32> to vector<8x32xf32>
    %73 = arith.addf %70, %72 : vector<8x32xf32>
    %c0_51 = arith.constant 0 : index
    %c0_52 = arith.constant 0 : index
    %c0_53 = arith.constant 0 : index
    %74 = vector.load %arg0[%c0_51, %c0_52, %c0_53] : memref<2x8x32xf32, #tpu.memory_space<vmem>>, vector<1x8x32xf32>
    %75 = vector.shape_cast %74 : vector<1x8x32xf32> to vector<8x32xf32>
    %76 = arith.addf %75, %73 : vector<8x32xf32>
    %77 = vector.broadcast %54 : vector<1x32xf32> to vector<8x32xf32>
    %78 = arith.addf %76, %77 : vector<8x32xf32>
    %cst_54 = arith.constant dense<0.000000e+00> : vector<8xf32>
    %79 = vector.multi_reduction <add>, %78, %cst_54 [1] : vector<8x32xf32> to vector<8xf32>
    %80 = vector.shape_cast %79 : vector<8xf32> to vector<8x1xf32>
    %cst_55 = arith.constant 3.200000e+01 : f32
    %81 = vector.broadcast %cst_55 : f32 to vector<8x1xf32>
    %82 = arith.divf %80, %81 : vector<8x1xf32>
    %83 = vector.broadcast %82 : vector<8x1xf32> to vector<8x32xf32>
    %84 = arith.subf %78, %83 : vector<8x32xf32>
    %85 = vector.broadcast %82 : vector<8x1xf32> to vector<8x32xf32>
    %86 = arith.subf %78, %85 : vector<8x32xf32>
    %87 = arith.mulf %84, %86 : vector<8x32xf32>
    %cst_56 = arith.constant dense<0.000000e+00> : vector<8xf32>
    %88 = vector.multi_reduction <add>, %87, %cst_56 [1] : vector<8x32xf32> to vector<8xf32>
    %89 = vector.shape_cast %88 : vector<8xf32> to vector<8x1xf32>
    %cst_57 = arith.constant 3.200000e+01 : f32
    %90 = vector.broadcast %cst_57 : f32 to vector<8x1xf32>
    %91 = arith.divf %89, %90 : vector<8x1xf32>
    %92 = vector.broadcast %82 : vector<8x1xf32> to vector<8x32xf32>
    %93 = arith.subf %78, %92 : vector<8x32xf32>
    %cst_58 = arith.constant 9.99999974E-6 : f32
    %94 = vector.broadcast %cst_58 : f32 to vector<8x1xf32>
    %95 = arith.addf %91, %94 : vector<8x1xf32>
    %96 = math.rsqrt %95 : vector<8x1xf32>
    %97 = vector.broadcast %96 : vector<8x1xf32> to vector<8x32xf32>
    %98 = arith.mulf %93, %97 : vector<8x32xf32>
    %99 = vector.broadcast %55 : vector<1x32xf32> to vector<8x32xf32>
    %100 = arith.mulf %98, %99 : vector<8x32xf32>
    %101 = vector.broadcast %56 : vector<1x32xf32> to vector<8x32xf32>
    %102 = arith.addf %100, %101 : vector<8x32xf32>
    %cst_59 = arith.constant dense<0.000000e+00> : vector<8x96xf32>
    %103 = tpu.matmul %102, %60, %cst_59 {dimension_numbers = #tpu.dot_dimension_numbers<[1], [0], [0], [1], [0, 0, 1, 1], [], []>} : vector<8x32xf32>, vector<32x96xf32>, vector<8x96xf32> -> vector<8x96xf32>
    %104 = vector.broadcast %61 : vector<1x96xf32> to vector<8x96xf32>
    %105 = arith.addf %103, %104 : vector<8x96xf32>
    %cst_60 = arith.constant 5.000000e-01 : f32
    %106 = vector.broadcast %cst_60 : f32 to vector<8x96xf32>
    %107 = arith.mulf %106, %105 : vector<8x96xf32>
    %cst_61 = arith.constant 0.707106769 : f32
    %108 = vector.broadcast %cst_61 : f32 to vector<8x96xf32>
    %109 = arith.mulf %105, %108 : vector<8x96xf32>
    %110 = math.erf %109 : vector<8x96xf32>
    %cst_62 = arith.constant 1.000000e+00 : f32
    %111 = vector.broadcast %cst_62 : f32 to vector<8x96xf32>
    %112 = arith.addf %111, %110 : vector<8x96xf32>
    %113 = arith.mulf %107, %112 : vector<8x96xf32>
    %cst_63 = arith.constant dense<0.000000e+00> : vector<8x32xf32>
    %114 = tpu.matmul %113, %62, %cst_63 {dimension_numbers = #tpu.dot_dimension_numbers<[1], [0], [0], [1], [0, 0, 1, 1], [], []>} : vector<8x96xf32>, vector<96x32xf32>, vector<8x32xf32> -> vector<8x32xf32>
    %115 = vector.broadcast %59 : vector<1x32xf32> to vector<8x32xf32>
    %116 = arith.addf %114, %115 : vector<8x32xf32>
    %117 = arith.addf %102, %116 : vector<8x32xf32>
    %cst_64 = arith.constant dense<0.000000e+00> : vector<8xf32>
    %118 = vector.multi_reduction <add>, %117, %cst_64 [1] : vector<8x32xf32> to vector<8xf32>
    %119 = vector.shape_cast %118 : vector<8xf32> to vector<8x1xf32>
    %cst_65 = arith.constant 3.200000e+01 : f32
    %120 = vector.broadcast %cst_65 : f32 to vector<8x1xf32>
    %121 = arith.divf %119, %120 : vector<8x1xf32>
    %122 = vector.broadcast %121 : vector<8x1xf32> to vector<8x32xf32>
    %123 = arith.subf %117, %122 : vector<8x32xf32>
    %124 = vector.broadcast %121 : vector<8x1xf32> to vector<8x32xf32>
    %125 = arith.subf %117, %124 : vector<8x32xf32>
    %126 = arith.mulf %123, %125 : vector<8x32xf32>
    %cst_66 = arith.constant dense<0.000000e+00> : vector<8xf32>
    %127 = vector.multi_reduction <add>, %126, %cst_66 [1] : vector<8x32xf32> to vector<8xf32>
    %128 = vector.shape_cast %127 : vector<8xf32> to vector<8x1xf32>
    %cst_67 = arith.constant 3.200000e+01 : f32
    %129 = vector.broadcast %cst_67 : f32 to vector<8x1xf32>
    %130 = arith.divf %128, %129 : vector<8x1xf32>
    %131 = vector.broadcast %121 : vector<8x1xf32> to vector<8x32xf32>
    %132 = arith.subf %117, %131 : vector<8x32xf32>
    %cst_68 = arith.constant 9.99999974E-6 : f32
    %133 = vector.broadcast %cst_68 : f32 to vector<8x1xf32>
    %134 = arith.addf %130, %133 : vector<8x1xf32>
    %135 = math.rsqrt %134 : vector<8x1xf32>
    %136 = vector.broadcast %135 : vector<8x1xf32> to vector<8x32xf32>
    %137 = arith.mulf %132, %136 : vector<8x32xf32>
    %138 = vector.broadcast %57 : vector<1x32xf32> to vector<8x32xf32>
    %139 = arith.mulf %137, %138 : vector<8x32xf32>
    %140 = vector.broadcast %58 : vector<1x32xf32> to vector<8x32xf32>
    %141 = arith.addf %139, %140 : vector<8x32xf32>
    %c0_69 = arith.constant 0 : index
    %c0_70 = arith.constant 0 : index
    %c0_71 = arith.constant 0 : index
    %142 = vector.load %arg12[%c0_69, %c0_70, %c0_71] : memref<2x8x32xf32, #tpu.memory_space<vmem>>, vector<1x8x32xf32>
    %143 = vector.shape_cast %142 : vector<1x8x32xf32> to vector<8x32xf32>
    %144 = vector.shape_cast %141 : vector<8x32xf32> to vector<1x8x32xf32>
    tpu.vector_store %arg12[%c0_69, %c0_70, %c0_71], %144 {strides = array<i32>} : memref<2x8x32xf32, #tpu.memory_space<vmem>>, vector<1x8x32xf32>,
    %145 = vector.extract_strided_slice %53 {offsets = [4, 0, 0], sizes = [1, 8, 32], strides = [1, 1, 1]} : vector<8x8x32xf32> to vector<1x8x32xf32>
    %146 = vector.shape_cast %145 : vector<1x8x32xf32> to vector<8x32xf32>
    %147 = vector.extract_strided_slice %53 {offsets = [5, 0, 0], sizes = [1, 8, 32], strides = [1, 1, 1]} : vector<8x8x32xf32> to vector<1x8x32xf32>
    %148 = vector.shape_cast %147 : vector<1x8x32xf32> to vector<8x32xf32>
    %149 = arith.addf %146, %148 : vector<8x32xf32>
    %150 = vector.extract_strided_slice %53 {offsets = [6, 0, 0], sizes = [1, 8, 32], strides = [1, 1, 1]} : vector<8x8x32xf32> to vector<1x8x32xf32>
    %151 = vector.shape_cast %150 : vector<1x8x32xf32> to vector<8x32xf32>
    %152 = arith.addf %149, %151 : vector<8x32xf32>
    %153 = vector.extract_strided_slice %53 {offsets = [7, 0, 0], sizes = [1, 8, 32], strides = [1, 1, 1]} : vector<8x8x32xf32> to vector<1x8x32xf32>
    %154 = vector.shape_cast %153 : vector<1x8x32xf32> to vector<8x32xf32>
    %155 = arith.addf %152, %154 : vector<8x32xf32>
    %c1_72 = arith.constant 1 : index
    %c0_73 = arith.constant 0 : index
    %c0_74 = arith.constant 0 : index
    %156 = vector.load %arg0[%c1_72, %c0_73, %c0_74] : memref<2x8x32xf32, #tpu.memory_space<vmem>>, vector<1x8x32xf32>
    %157 = vector.shape_cast %156 : vector<1x8x32xf32> to vector<8x32xf32>
    %158 = arith.addf %157, %155 : vector<8x32xf32>
    %159 = vector.broadcast %54 : vector<1x32xf32> to vector<8x32xf32>
    %160 = arith.addf %158, %159 : vector<8x32xf32>
    %cst_75 = arith.constant dense<0.000000e+00> : vector<8xf32>
    %161 = vector.multi_reduction <add>, %160, %cst_75 [1] : vector<8x32xf32> to vector<8xf32>
    %162 = vector.shape_cast %161 : vector<8xf32> to vector<8x1xf32>
    %cst_76 = arith.constant 3.200000e+01 : f32
    %163 = vector.broadcast %cst_76 : f32 to vector<8x1xf32>
    %164 = arith.divf %162, %163 : vector<8x1xf32>
    %165 = vector.broadcast %164 : vector<8x1xf32> to vector<8x32xf32>
    %166 = arith.subf %160, %165 : vector<8x32xf32>
    %167 = vector.broadcast %164 : vector<8x1xf32> to vector<8x32xf32>
    %168 = arith.subf %160, %167 : vector<8x32xf32>
    %169 = arith.mulf %166, %168 : vector<8x32xf32>
    %cst_77 = arith.constant dense<0.000000e+00> : vector<8xf32>
    %170 = vector.multi_reduction <add>, %169, %cst_77 [1] : vector<8x32xf32> to vector<8xf32>
    %171 = vector.shape_cast %170 : vector<8xf32> to vector<8x1xf32>
    %cst_78 = arith.constant 3.200000e+01 : f32
    %172 = vector.broadcast %cst_78 : f32 to vector<8x1xf32>
    %173 = arith.divf %171, %172 : vector<8x1xf32>
    %174 = vector.broadcast %164 : vector<8x1xf32> to vector<8x32xf32>
    %175 = arith.subf %160, %174 : vector<8x32xf32>
    %cst_79 = arith.constant 9.99999974E-6 : f32
    %176 = vector.broadcast %cst_79 : f32 to vector<8x1xf32>
    %177 = arith.addf %173, %176 : vector<8x1xf32>
    %178 = math.rsqrt %177 : vector<8x1xf32>
    %179 = vector.broadcast %178 : vector<8x1xf32> to vector<8x32xf32>
    %180 = arith.mulf %175, %179 : vector<8x32xf32>
    %181 = vector.broadcast %55 : vector<1x32xf32> to vector<8x32xf32>
    %182 = arith.mulf %180, %181 : vector<8x32xf32>
    %183 = vector.broadcast %56 : vector<1x32xf32> to vector<8x32xf32>
    %184 = arith.addf %182, %183 : vector<8x32xf32>
    %cst_80 = arith.constant dense<0.000000e+00> : vector<8x96xf32>
    %185 = tpu.matmul %184, %60, %cst_80 {dimension_numbers = #tpu.dot_dimension_numbers<[1], [0], [0], [1], [0, 0, 1, 1], [], []>} : vector<8x32xf32>, vector<32x96xf32>, vector<8x96xf32> -> vector<8x96xf32>
    %186 = vector.broadcast %61 : vector<1x96xf32> to vector<8x96xf32>
    %187 = arith.addf %185, %186 : vector<8x96xf32>
    %cst_81 = arith.constant 5.000000e-01 : f32
    %188 = vector.broadcast %cst_81 : f32 to vector<8x96xf32>
    %189 = arith.mulf %188, %187 : vector<8x96xf32>
    %cst_82 = arith.constant 0.707106769 : f32
    %190 = vector.broadcast %cst_82 : f32 to vector<8x96xf32>
    %191 = arith.mulf %187, %190 : vector<8x96xf32>
    %192 = math.erf %191 : vector<8x96xf32>
    %cst_83 = arith.constant 1.000000e+00 : f32
    %193 = vector.broadcast %cst_83 : f32 to vector<8x96xf32>
    %194 = arith.addf %193, %192 : vector<8x96xf32>
    %195 = arith.mulf %189, %194 : vector<8x96xf32>
    %cst_84 = arith.constant dense<0.000000e+00> : vector<8x32xf32>
    %196 = tpu.matmul %195, %62, %cst_84 {dimension_numbers = #tpu.dot_dimension_numbers<[1], [0], [0], [1], [0, 0, 1, 1], [], []>} : vector<8x96xf32>, vector<96x32xf32>, vector<8x32xf32> -> vector<8x32xf32>
    %197 = vector.broadcast %59 : vector<1x32xf32> to vector<8x32xf32>
    %198 = arith.addf %196, %197 : vector<8x32xf32>
    %199 = arith.addf %184, %198 : vector<8x32xf32>
    %cst_85 = arith.constant dense<0.000000e+00> : vector<8xf32>
    %200 = vector.multi_reduction <add>, %199, %cst_85 [1] : vector<8x32xf32> to vector<8xf32>
    %201 = vector.shape_cast %200 : vector<8xf32> to vector<8x1xf32>
    %cst_86 = arith.constant 3.200000e+01 : f32
    %202 = vector.broadcast %cst_86 : f32 to vector<8x1xf32>
    %203 = arith.divf %201, %202 : vector<8x1xf32>
    %204 = vector.broadcast %203 : vector<8x1xf32> to vector<8x32xf32>
    %205 = arith.subf %199, %204 : vector<8x32xf32>
    %206 = vector.broadcast %203 : vector<8x1xf32> to vector<8x32xf32>
    %207 = arith.subf %199, %206 : vector<8x32xf32>
    %208 = arith.mulf %205, %207 : vector<8x32xf32>
    %cst_87 = arith.constant dense<0.000000e+00> : vector<8xf32>
    %209 = vector.multi_reduction <add>, %208, %cst_87 [1] : vector<8x32xf32> to vector<8xf32>
    %210 = vector.shape_cast %209 : vector<8xf32> to vector<8x1xf32>
    %cst_88 = arith.constant 3.200000e+01 : f32
    %211 = vector.broadcast %cst_88 : f32 to vector<8x1xf32>
    %212 = arith.divf %210, %211 : vector<8x1xf32>
    %213 = vector.broadcast %203 : vector<8x1xf32> to vector<8x32xf32>
    %214 = arith.subf %199, %213 : vector<8x32xf32>
    %cst_89 = arith.constant 9.99999974E-6 : f32
    %215 = vector.broadcast %cst_89 : f32 to vector<8x1xf32>
    %216 = arith.addf %212, %215 : vector<8x1xf32>
    %217 = math.rsqrt %216 : vector<8x1xf32>
    %218 = vector.broadcast %217 : vector<8x1xf32> to vector<8x32xf32>
    %219 = arith.mulf %214, %218 : vector<8x32xf32>
    %220 = vector.broadcast %57 : vector<1x32xf32> to vector<8x32xf32>
    %221 = arith.mulf %219, %220 : vector<8x32xf32>
    %222 = vector.broadcast %58 : vector<1x32xf32> to vector<8x32xf32>
    %223 = arith.addf %221, %222 : vector<8x32xf32>
    %c1_90 = arith.constant 1 : index
    %c0_91 = arith.constant 0 : index
    %c0_92 = arith.constant 0 : index
    %224 = vector.load %arg12[%c1_90, %c0_91, %c0_92] : memref<2x8x32xf32, #tpu.memory_space<vmem>>, vector<1x8x32xf32>
    %225 = vector.shape_cast %224 : vector<1x8x32xf32> to vector<8x32xf32>
    %226 = vector.shape_cast %223 : vector<8x32xf32> to vector<1x8x32xf32>
    tpu.vector_store %arg12[%c1_90, %c0_91, %c0_92], %226 {strides = array<i32>} : memref<2x8x32xf32, #tpu.memory_space<vmem>>, vector<1x8x32xf32>,
    return
  }
}

</mosaic_0001>

<bundles_post_ra>
// kernel: tpu_custom_call.1
= control target key start
LH: loop header
LB: loop body
LE: loop exit
PB: predicated region body
PF: predicated region fallthrough
CT: control target
= control target key end

     0   :  { %v4544_v3 = vmov 0.0|0.0   ;;  %vm4545_vm0 = vmmov 0   ;;  %v4546_v11 = vmov 0.0   ;;  %vm141_vm1 = vcmask 261120   ;;  %s5314_s0 = inlined_call_operand.vmem [shape: f32[2,8,32], index: 0, kind: input, shape index: {}]   ;;  %s5315_s1 = inlined_call_operand.vmem [shape: f32[2,8,32], index: 1, kind: input, shape index: {}]   ;;  %s5316_s2 = inlined_call_operand.vmem [shape: f32[2,8,32], index: 2, kind: input, shape index: {}]   ;;  %s5317_s3 = inlined_call_operand.vmem [shape: f32[8,32,8], index: 3, kind: input, shape index: {}]   ;;  %s5318_s4 = inlined_call_operand.vmem [shape: f32[8,1,8], index: 4, kind: input, shape index: {}]   ;;  %s5319_s5 = inlined_call_operand.vmem [shape: f32[8,32,16], index: 5, kind: input, shape index: {}]   ;;  %s5320_s6 = inlined_call_operand.vmem [shape: f32[8,1,16], index: 6, kind: input, shape index: {}]   ;;  %s5321_s7 = inlined_call_operand.vmem [shape: f32[8,8,32], index: 7, kind: input, shape index: {}]   ;;  %s5322_s8 = inlined_call_operand.vmem [shape: f32[32,96], index: 8, kind: input, shape index: {}]   ;;  %s5323_s9 = inlined_call_operand.vmem [shape: f32[1,96], index: 9, kind: input, shape index: {}]   ;;  %s5324_s10 = inlined_call_operand.vmem [shape: f32[96,32], index: 10, kind: input, shape index: {}]   ;;  %s5325_s11 = inlined_call_operand.vmem [shape: f32[6,32], index: 11, kind: input, shape index: {}]   ;;  %s5326_s12 = inlined_call_operand.hbm [shape: f32[2,8,32], index: 12, kind: output, shape index: {}]  }
   0x1   :  { %v53_v0 = vld [vmem:[%s5317_s3] sm:$0xff]  ;;  %v54_v1 = vld [vmem:[%s5317_s3 + $0x8] sm:$0xff]  ;;  %4324 = vmatprep.subr.bf16.mxu1 %v4544_v3  ;;  %4336 = vmatprep.subr.bf16.mxu0 %v4544_v3  ;;  %v55_v6 = vld [vmem:[%s5317_s3 + $0x10] sm:$0xff] }
   0x2   :  { %v61_v2 = vld [vmem:[%s5317_s3 + $0x40] sm:$0xff]  ;;  %v4325_v4 = vpack.c.bf16 %v54_v1, %v53_v0  ;;  %v62_v5 = vld [vmem:[%s5317_s3 + $0x48] sm:$0xff]  ;;  %v56_v7 = vld [vmem:[%s5317_s3 + $0x18] sm:$0xff]  ;;  %3960 = vmatprep.mubr.msk.f32.mxu1 %vm4545_vm0, %v4546_v11  ;;  %3982 = vmatprep.mubr.msk.f32.mxu0 %vm4545_vm0, %v4546_v11 }
   0x3   :  { %v4337_v8 = vpack.c.bf16 %v62_v5, %v61_v2  ;;  %v63_v9 = vld [vmem:[%s5317_s3 + $0x50] sm:$0xff]  ;;  %v64_v10 = vld [vmem:[%s5317_s3 + $0x58] sm:$0xff]  ;;  %v4328_v12 = vpack.c.bf16 %v56_v7, %v55_v6  ;;  %v42_v13 = vld [vmem:[%s5314_s0] sm:$0xff] }
   0x4   :  { %4326 = vmatpush3.bf16.msra.mxu1 %v4325_v4  ;;  %v43_v14 = vld [vmem:[%s5316_s2] sm:$0xff]  ;;  %v4340_v15 = vpack.c.bf16 %v64_v10, %v63_v9  ;;  %v58_v17 = vld [vmem:[%s5317_s3 + $0x28] sm:$0xff]  ;;  %v59_v23 = vld [vmem:[%s5317_s3 + $0x30] sm:$0xff] }
   0x5   :  { %4338 = vmatpush3.bf16.msra.mxu0 %v4337_v8  ;;  %4327 = vmatprep.subr.bf16.mxu1 %v4544_v3  ;;  %v57_v16 = vld [vmem:[%s5317_s3 + $0x20] sm:$0xff]  ;;  %v70_v19 = vld [vmem:[%s5317_s3 + $0x88] sm:$0xff]  ;;  %v4666_v20 = vadd.f32 %v43_v14, %v42_v13  ;;  %v60_v24 = vld [vmem:[%s5317_s3 + $0x38] sm:$0xff] }
   0x6   :  { %4339 = vmatprep.subr.bf16.mxu0 %v4544_v3  ;;  %v69_v18 = vld [vmem:[%s5317_s3 + $0x80] sm:$0xff]  ;;  %v4331_v21 = vpack.c.bf16 %v58_v17, %v57_v16  ;;  %v71_v25 = vld [vmem:[%s5317_s3 + $0x90] sm:$0xff]  ;;  %v72_v26 = vld [vmem:[%s5317_s3 + $0x98] sm:$0xff]  ;;  %v4334_v27 = vpack.c.bf16 %v60_v24, %v59_v23 }
   0x7   :  { %v4349_v22 = vpack.c.bf16 %v70_v19, %v69_v18  ;;  %v65_v28 = vld [vmem:[%s5317_s3 + $0x60] sm:$0xff]  ;;  %v4352_v29 = vpack.c.bf16 %v72_v26, %v71_v25  ;;  %v66_v30 = vld [vmem:[%s5317_s3 + $0x68] sm:$0xff]  ;;  %v67_v38 = vld [vmem:[%s5317_s3 + $0x70] sm:$0xff] }
   0x8   :  { %4329 = vmatpush3.bf16.msra.mxu1 %v4328_v12  ;;  %v4696_v31 = vld [vmem:[%s5314_s0 + $0x8] sm:$0xff]  ;;  %v77_v33 = vld [vmem:[%s5317_s3 + $0xc0] sm:$0xff]  ;;  %v4343_v35 = vpack.c.bf16 %v66_v30, %v65_v28  ;;  %v68_v39 = vld [vmem:[%s5317_s3 + $0x78] sm:$0xff] }
   0x9   :  { %4341 = vmatpush3.bf16.msra.mxu0 %v4340_v15  ;;  %4330 = vmatprep.subr.bf16.mxu1 %v4544_v3  ;;  %v3710_v32 = vld [vmem:[%s5316_s2 + $0x8] sm:$0xff]  ;;  %v79_v40 = vld [vmem:[%s5317_s3 + $0xd0] sm:$0xff]  ;;  %v80_v41 = vld [vmem:[%s5317_s3 + $0xd8] sm:$0xff]  ;;  %v4346_v42 = vpack.c.bf16 %v68_v39, %v67_v38 }
   0xa   :  { %4348 = vmatprep.subr.bf16.mxu0 %v4544_v3  ;;  %v78_v34 = vld [vmem:[%s5317_s3 + $0xc8] sm:$0xff]  ;;  %v4713_v36 = vadd.f32 %v3710_v32, %v4696_v31  ;;  %v4364_v43 = vpack.c.bf16 %v80_v41, %v79_v40  ;;  %v73_v44 = vld [vmem:[%s5317_s3 + $0xa0] sm:$0xff] }
   0xb   :  { %3961 = vmatmul.mubr.msk.f32.vlgmr.msra.gmra.mrb[0].mxu1 %vm141_vm1, %v4666_v20  ;;  %v4361_v37 = vpack.c.bf16 %v78_v34, %v77_v33  ;;  %v74_v45 = vld [vmem:[%s5317_s3 + $0xa8] sm:$0xff]  ;;  %v708_v46 = vld [vmem:[%s5319_s5] sm:$0xff] }
   0xc   :  { %4332 = vmatpush3.bf16.msra.mxu1 %v4331_v21  ;;  %3983 = vmatmul.mubr.msk.f32.vlgmr.msra.gmra.mrb[0].mxu0 %vm141_vm1, %v4666_v20  ;;  %v709_v47 = vld [vmem:[%s5319_s5 + $0x8] sm:$0xff]  ;;  %v4355_v48 = vpack.c.bf16 %v74_v45, %v73_v44 }
   0xd   :  { %4350 = vmatpush3.bf16.msra.mxu0 %v4349_v22  ;;  %4333 = vmatprep.subr.bf16.mxu1 %v4544_v3 }
   0xe   :  { %4351 = vmatprep.subr.bf16.mxu0 %v4544_v3  ;;  %3971 = vmatprep.mubr.msk.f32.mxu1 %vm4545_vm0, %v4546_v11 }
   0xf   :  { %4004 = vmatprep.mubr.msk.f32.mxu0 %vm4545_vm0, %v4546_v11 }
  0x10   :  { %4335 = vmatpush3.bf16.msra.mxu1 %v4334_v27 }
  0x11   :  { %4353 = vmatpush3.bf16.msra.mxu0 %v4352_v29  ;;  %4342 = vmatprep.subr.bf16.mxu1 %v4544_v3 }
  0x12   :  { %4360 = vmatprep.subr.bf16.mxu0 %v4544_v3 }
  0x13   :  { %3972 = vmatmul.mubr.msk.f32.vlgmr.msra.gmra.mrb[2].mxu1 %vm141_vm1, %v4666_v20 }
  0x14   :  { %4344 = vmatpush3.bf16.msra.mxu1 %v4343_v35  ;;  %4005 = vmatmul.mubr.msk.f32.vlgmr.msra.gmra.mrb[2].mxu0 %vm141_vm1, %v4713_v36 }
  0x15   :  { %4362 = vmatpush3.bf16.msra.mxu0 %v4361_v37  ;;  %4345 = vmatprep.subr.bf16.mxu1 %v4544_v3 }
  0x16   :  { %4363 = vmatprep.subr.bf16.mxu0 %v4544_v3  ;;  %3993 = vmatprep.mubr.msk.f32.mxu1 %vm4545_vm0, %v4546_v11 }
  0x17   :  { %4026 = vmatprep.mubr.msk.f32.mxu0 %vm4545_vm0, %v4546_v11 }
  0x18   :  { %4347 = vmatpush3.bf16.msra.mxu1 %v4346_v42 }
  0x19   :  { %17 = vsyncpa [#allocation3], 0  ;;  %4365 = vmatpush3.bf16.msra.mxu0 %v4364_v43  ;;  %4354 = vmatprep.subr.bf16.mxu1 %v4544_v3  ;;  %v4373_v49 = vpack.c.bf16 %v709_v47, %v708_v46  ;;  %v75_v50 = vld [vmem:[%s5317_s3 + $0xb0] sm:$0xff]  ;;  %v76_v51 = vld [vmem:[%s5317_s3 + $0xb8] sm:$0xff]  ;;  %vm1362_vm2 = vcmask 64512   ;;  %vm3404_vm3 = vcmask 785408  }
  0x1a   :  { %4372 = vmatprep.subr.bf16.mxu0 %v4544_v3  ;;  %v710_v52 = vld [vmem:[%s5319_s5 + $0x10] sm:$0xff]  ;;  %v711_v53 = vld [vmem:[%s5319_s5 + $0x18] sm:$0xff]  ;;  %v4358_v54 = vpack.c.bf16 %v76_v51, %v75_v50  ;;  %v81_v56 = vld [vmem:[%s5317_s3 + $0xe0] sm:$0xff]  ;;  %s4548_s21 = smov [#allocation2]  }
  0x1b   :  { %3994 = vmatmul.mubr.msk.f32.vlgmr.msra.gmra.mrb[4].mxu1 %vm141_vm1, %v4666_v20  ;;  %v4376_v55 = vpack.c.bf16 %v711_v53, %v710_v52  ;;  %v82_v57 = vld [vmem:[%s5317_s3 + $0xe8] sm:$0xff]  ;;  %v716_v58 = vld [vmem:[%s5319_s5 + $0x40] sm:$0xff]  ;;  %v83_v63 = vld [vmem:[%s5317_s3 + $0xf0] sm:$0xff]  ;;  %s3698_s22 = sshll.u32 %s4548_s21, 4  ;;  %s3699_s22 = int_to_ptr.vmem [resolvable:$true] %s3698_s22 }
  0x1c   :  { %4356 = vmatpush3.bf16.msra.mxu1 %v4355_v48  ;;  %4027 = vmatmul.mubr.msk.f32.vlgmr.msra.gmra.mrb[4].mxu0 %vm141_vm1, %v4713_v36  ;;  %v717_v59 = vld [vmem:[%s5319_s5 + $0x48] sm:$0xff]  ;;  %v4367_v60 = vpack.c.bf16 %v82_v57, %v81_v56  ;;  %v4791_v61 = vld [vmem:[%s5315_s1] sm:$0xff]  ;;  %v84_v0 = vld [vmem:[%s5317_s3 + $0xf8] sm:$0xff]  ;;  %s4520_s23 = scalar_lea.vmem %s3699_s22, 256  ;;  %p4525_p1 = scmp.lt.s32.totalorder %s3699_s22, %s3699_s22 }
  0x1d   :  { %4374 = vmatpush3.bf16.msra.mxu0 %v4373_v49  ;;  %4357 = vmatprep.subr.bf16.mxu1 %v4544_v3  ;;  %v4385_v62 = vpack.c.bf16 %v717_v59, %v716_v58  ;;  %v718_v1 = vld [vmem:[%s5319_s5 + $0x50] sm:$0xff]  ;;  %v719_v2 = vld [vmem:[%s5319_s5 + $0x58] sm:$0xff]  ;;  %v4370_v4 = vpack.c.bf16 %v84_v0, %v83_v63  ;;  %v712_v6 = vld [vmem:[%s5319_s5 + $0x20] sm:$0xff]  ;;  %p4521_p0 = scmp.ne.s32.totalorder %s3699_s22, %s4520_s23  ;;  %p4526_p2 = scmp.lt.s32.totalorder %s4520_s23, %s4520_s23 }
  0x1e   :  { %4375 = vmatprep.subr.bf16.mxu0 %v4544_v3  ;;  %4015 = vmatprep.mubr.msk.f32.mxu1 %vm4545_vm0, %v4546_v11  ;;  %v4388_v5 = vpack.c.bf16 %v719_v2, %v718_v1  ;;  %v713_v7 = vld [vmem:[%s5319_s5 + $0x28] sm:$0xff]  ;;  %v724_v8 = vld [vmem:[%s5319_s5 + $0x80] sm:$0xff]  ;;  %v714_v13 = vld [vmem:[%s5319_s5 + $0x30] sm:$0xff] }
  0x1f   :  { %4048 = vmatprep.mubr.msk.f32.mxu0 %vm4545_vm0, %v4546_v11  ;;  %v725_v9 = vld [vmem:[%s5319_s5 + $0x88] sm:$0xff]  ;;  %v4379_v10 = vpack.c.bf16 %v713_v7, %v712_v6  ;;  %v715_v14 = vld [vmem:[%s5319_s5 + $0x38] sm:$0xff]  ;;  %v726_v15 = vld [vmem:[%s5319_s5 + $0x90] sm:$0xff]  ;;  %p4527_p3 = por %p4526_p2, %p4525_p1 }
  0x20   :  { %4359 = vmatpush3.bf16.msra.mxu1 %v4358_v54  ;;  %v4397_v12 = vpack.c.bf16 %v725_v9, %v724_v8  ;;  %v727_v16 = vld [vmem:[%s5319_s5 + $0x98] sm:$0xff]  ;;  %v4382_v17 = vpack.c.bf16 %v715_v14, %v714_v13  ;;  %v720_v19 = vld [vmem:[%s5319_s5 + $0x60] sm:$0xff]  ;;  %v721_v20 = vld [vmem:[%s5319_s5 + $0x68] sm:$0xff] }
  0x21   :  { %4377 = vmatpush3.bf16.msra.mxu0 %v4376_v55  ;;  %4366 = vmatprep.subr.bf16.mxu1 %v4544_v3  ;;  %v4400_v18 = vpack.c.bf16 %v727_v16, %v726_v15  ;;  %v732_v21 = vld [vmem:[%s5319_s5 + $0xc0] sm:$0xff]  ;;  %v733_v22 = vld [vmem:[%s5319_s5 + $0xc8] sm:$0xff]  ;;  %v4391_v23 = vpack.c.bf16 %v721_v20, %v720_v19  ;;  %v722_v26 = vld [vmem:[%s5319_s5 + $0x70] sm:$0xff]  ;;  %p4528_p4 = pnand %p4527_p3, %p4521_p0 }
  0x22   :  { %4384 = vmatprep.subr.bf16.mxu0 %v4544_v3  ;;  %v3711_v24 = vld [vmem:[%s5315_s1 + $0x8] sm:$0xff]  ;;  %v4409_v25 = vpack.c.bf16 %v733_v22, %v732_v21  ;;  %v723_v27 = vld [vmem:[%s5319_s5 + $0x78] sm:$0xff]  ;;  %v734_v28 = vld [vmem:[%s5319_s5 + $0xd0] sm:$0xff] }
  0x23   :  { %4016 = vmatmul.mubr.msk.f32.vlgmr.msra.gmra.mrb[6].mxu1 %vm141_vm1, %v4713_v36  ;;  %v735_v29 = vld [vmem:[%s5319_s5 + $0xd8] sm:$0xff]  ;;  %v4394_v30 = vpack.c.bf16 %v723_v27, %v722_v26  ;;  %v728_v33 = vld [vmem:[%s5319_s5 + $0xa0] sm:$0xff]  ;;  %v729_v34 = vld [vmem:[%s5319_s5 + $0xa8] sm:$0xff] }
  0x24   :  { %4049 = vmatmul.mubr.msk.f32.vlgmr.msra.gmra.mrb[6].mxu0 %vm141_vm1, %v4791_v61  ;;  %4368 = vmatpush3.bf16.msra.mxu1 %v4367_v60  ;;  %v4412_v32 = vpack.c.bf16 %v735_v29, %v734_v28  ;;  %v4403_v35 = vpack.c.bf16 %v729_v34, %v728_v33  ;;  %v731_v37 = vld [vmem:[%s5319_s5 + $0xb8] sm:$0xff]  ;;  %v736_v39 = vld [vmem:[%s5319_s5 + $0xe0] sm:$0xff]  ;;  %v737_v40 = vld [vmem:[%s5319_s5 + $0xe8] sm:$0xff] }
  0x25   :  { %4386 = vmatpush3.bf16.msra.mxu0 %v4385_v62  ;;  %4369 = vmatprep.subr.bf16.mxu1 %v4544_v3  ;;  %v4415_v41 = vpack.c.bf16 %v737_v40, %v736_v39  ;;  %v738_v42 = vld [vmem:[%s5319_s5 + $0xf0] sm:$0xff]  ;;  %v739_v43 = vld [vmem:[%s5319_s5 + $0xf8] sm:$0xff]  ;;  %v3728_v57 = vld [vmem:[%s5320_s6] ss:$0 sm:$0xff] }
  0x26   :  { %4387 = vmatprep.subr.bf16.mxu0 %v4544_v3  ;;  %4037 = vmatprep.mubr.msk.f32.mxu1 %vm4545_vm0, %v4546_v11  ;;  %v4418_v44 = vpack.c.bf16 %v739_v43, %v738_v42  ;;  %v3730_v1 = vld [vmem:[%s5320_s6 + $0x2] ss:$0 sm:$0xff]  ;;  %v3713_v14 = vld [vmem:[%s5318_s4 + $0x1] ss:$0 sm:$0xff]  ;;  %v3715_v26 = vld [vmem:[%s5318_s4 + $0x3] ss:$0 sm:$0xff] }
  0x27   :  { %4070 = vmatprep.mubr.msk.f32.mxu0 %vm4545_vm0, %v4546_v11  ;;  %v3714_v6 = vld [vmem:[%s5318_s4 + $0x2] ss:$0 sm:$0xff]  ;;  %v3735_v42 = vld [vmem:[%s5320_s6 + $0x7] ss:$0 sm:$0xff] }
  0x28   :  { %4371 = vmatpush3.bf16.msra.mxu1 %v4370_v4 }
  0x29   :  { %4389 = vmatpush3.bf16.msra.mxu0 %v4388_v5  ;;  %4378 = vmatprep.subr.bf16.mxu1 %v4544_v3 }
  0x2a   :  { %4396 = vmatprep.subr.bf16.mxu0 %v4544_v3 }
  0x2b   :  { %4038 = vmatmul.mubr.msk.f32.vlgmr.msra.gmra.mrb[8].mxu1 %vm141_vm1, %v4713_v36  ;;  %v730_v36 = vld [vmem:[%s5319_s5 + $0xb0] sm:$0xff] }
  0x2c   :  { %4071 = vmatmul.mubr.msk.f32.vlgmr.msra.gmra.mrb[8].mxu0 %vm141_vm1, %v4791_v61  ;;  %4380 = vmatpush3.bf16.msra.mxu1 %v4379_v10  ;;  %v4406_v38 = vpack.c.bf16 %v731_v37, %v730_v36  ;;  %v3729_v10 = vld [vmem:[%s5320_s6 + $0x1] ss:$0 sm:$0xff]  ;;  %v3733_v36 = vld [vmem:[%s5320_s6 + $0x5] ss:$0 sm:$0xff] }
  0x2d   :  { %4398 = vmatpush3.bf16.msra.mxu0 %v4397_v12  ;;  %4381 = vmatprep.subr.bf16.mxu1 %v4544_v3  ;;  %v3732_v12 = vld [vmem:[%s5320_s6 + $0x4] ss:$0 sm:$0xff] }
  0x2e   :  { %4399 = vmatprep.subr.bf16.mxu0 %v4544_v3  ;;  %4059 = vmatprep.mubr.msk.f32.mxu1 %vm4545_vm0, %v4546_v11 }
  0x2f   :  { %4092 = vmatprep.mubr.msk.f32.mxu0 %vm4545_vm0, %v4546_v11 }
  0x30   :  { %4383 = vmatpush3.bf16.msra.mxu1 %v4382_v17 }
  0x31   :  { %4401 = vmatpush3.bf16.msra.mxu0 %v4400_v18  ;;  %4390 = vmatprep.subr.bf16.mxu1 %v4544_v3  ;;  %v3716_v18 = vld [vmem:[%s5318_s4 + $0x4] ss:$0 sm:$0xff] }
  0x32   :  { %4408 = vmatprep.subr.bf16.mxu0 %v4544_v3 }
  0x33   :  { %4060 = vmatmul.mubr.msk.f32.vlgmr.msra.gmra.mrb[10].mxu1 %vm141_vm1, %v4791_v61 }
  0x34   :  { %4093 = vmatmul.mubr.msk.f32.vlgmr.msra.gmra.mrb[10].mxu0 %vm141_vm1, %v3711_v24  ;;  %4392 = vmatpush3.bf16.msra.mxu1 %v4391_v23  ;;  %v3731_v23 = vld [vmem:[%s5320_s6 + $0x3] ss:$0 sm:$0xff] }
  0x35   :  { %4410 = vmatpush3.bf16.msra.mxu0 %v4409_v25  ;;  %4393 = vmatprep.subr.bf16.mxu1 %v4544_v3 }
  0x36   :  { %4411 = vmatprep.subr.bf16.mxu0 %v4544_v3  ;;  %4081 = vmatprep.mubr.msk.f32.mxu1 %vm4545_vm0, %v4546_v11 }
  0x37   :  { %4114 = vmatprep.mubr.msk.f32.mxu0 %vm4545_vm0, %v4546_v11 }
  0x38   :  { %4395 = vmatpush3.bf16.msra.mxu1 %v4394_v30  ;;  %v3718_v30 = vld [vmem:[%s5318_s4 + $0x6] ss:$0 sm:$0xff] }
  0x39   :  { %4413 = vmatpush3.bf16.msra.mxu0 %v4412_v32  ;;  %4402 = vmatprep.subr.bf16.mxu1 %v4544_v3 }
  0x3a   :  { %4128 = vmatprep.subr.mxu0 %v4546_v11 }
  0x3b   :  { %4082 = vmatmul.mubr.msk.f32.vlgmr.msra.gmra.mrb[12].mxu1 %vm141_vm1, %v4791_v61  ;;  %v3712_v61 = vld [vmem:[%s5318_s4] ss:$0 sm:$0xff] }
  0x3c   :  { %4115 = vmatmul.mubr.msk.f32.vlgmr.msra.gmra.mrb[12].mxu0 %vm141_vm1, %v3711_v24  ;;  %4404 = vmatpush3.bf16.msra.mxu1 %v4403_v35 }
  0x3d   :  { %4405 = vmatprep.subr.bf16.mxu1 %v4544_v3  ;;  %4103 = vmatprep.mubr.msk.f32.mxu1 %vm4545_vm0, %v4546_v11 }
  0x3e   :  { %4130 = vmatprep.mubr.msk.f32.mxu0 %vm4545_vm0, %v4546_v11 }
  0x40   :  { %4407 = vmatpush3.bf16.msra.mxu1 %v4406_v38  ;;  %v3717_v38 = vld [vmem:[%s5318_s4 + $0x5] ss:$0 sm:$0xff] }
  0x41   :  { %4414 = vmatprep.subr.bf16.mxu1 %v4544_v3 }
  0x43   :  { %4104 = vmatmul.mubr.msk.f32.vlgmr.msra.gmra.mrb[14].mxu1 %vm141_vm1, %v3711_v24 }
  0x44   :  { %4416 = vmatpush3.bf16.msra.mxu1 %v4415_v41  ;;  %4125 = vmatprep.mubr.msk.f32.mxu1 %vm4545_vm0, %v4546_v11 }
  0x45   :  { %4417 = vmatprep.subr.bf16.mxu1 %v4544_v3 }
  0x48   :  { %4419 = vmatpush3.bf16.msra.mxu1 %v4418_v44  ;;  %v3719_v44 = vld [vmem:[%s5318_s4 + $0x7] ss:$0 sm:$0xff]  ;;  %s4547_s4 = smov 120  }
  0x49   :  { %4133 = vmatprep.subr.mxu1 %v4546_v11 }
  0x4b   :  { %4126 = vmatmul.mubr.msk.f32.vlgmr.msra.gmra.mrb[16].mxu1 %vm141_vm1, %v3711_v24  ;;  %v3734_v24 = vld [vmem:[%s5320_s6 + $0x6] ss:$0 sm:$0xff] }
  0x4c   :  { %4135 = vmatprep.mubr.msk.f32.mxu1 %vm4545_vm0, %v4546_v11 }
  0xde   :  { %v211_v45 = vpop.f32.mrb[0].mxu1 }
  0xdf   :  { %v3962_v46 = vpop.f32.mrb[1].mxu1  ;;  %v351_v47 = vpop.f32.mrb[0].mxu0  ;;  %v212_v0 = vadd.f32 %v3712_v61, %v211_v45 }
  0xe0   :  { %v3984_v48 = vpop.f32.mrb[1].mxu0  ;;  %v352_v9 = vadd.f32 %v3714_v6, %v351_v47 }
  0xe6   :  { %v281_v49 = vpop.f32.mrb[2].mxu1 }
  0xe7   :  { %v3973_v50 = vpop.f32.mrb[3].mxu1  ;;  %v494_v51 = vpop.f32.mrb[2].mxu0  ;;  %v282_v21 = vadd.f32 %v3713_v14, %v281_v49 }
  0xe8   :  { %v4006_v52 = vpop.f32.mrb[3].mxu0  ;;  %v495_v22 = vadd.f32 %v3716_v18, %v494_v51 }
  0xee   :  { %v421_v53 = vpop.f32.mrb[4].mxu1 }
  0xef   :  { %v3995_v54 = vpop.f32.mrb[5].mxu1  ;;  %v634_v55 = vpop.f32.mrb[4].mxu0  ;;  %v422_v34 = vadd.f32 %v3715_v26, %v421_v53 }
  0xf0   :  { %v4028_v56 = vpop.f32.mrb[5].mxu0  ;;  %v635_v35 = vadd.f32 %v3718_v30, %v634_v55 }
  0xf6   :  { %v4936_v58 = vpop.f32.mrb[6].mxu1 }
  0xf7   :  { %v865_v59 = vpop.f32.mrb[6].mxu0  ;;  %v4017_v60 = vpop.f32.mrb[7].mxu1  ;;  %v565_v41 = vadd.f32 %v3717_v38, %v4936_v58 }
  0xf8   :  { %v4941_v62 = vadd.f32 %v3728_v57, %v865_v59  ;;  %v4050_v63 = vpop.f32.mrb[7].mxu0 }
  0xfa   :  { %4129 = vmatpush3.xpose.msk.msra.mxu0 %vm1362_vm2, %v4941_v62 }
  0xfb   :  { %4138 = vmatprep.subr.mxu0 %v4546_v11 }
  0xfd   :  { %4131 = vmatmul.mubr.msk.f32.vlgmr.msra.gmra.mrb[14].mxu0 %vm1362_vm2, %v212_v0 }
  0xfe   :  { %v4950_v2 = vpop.f32.mrb[8].mxu1  ;;  %4140 = vmatprep.mubr.msk.f32.mxu0 %vm4545_vm0, %v4546_v11 }
  0xff   :  { %v1005_v4 = vpop.f32.mrb[8].mxu0  ;;  %v4039_v5 = vpop.f32.mrb[9].mxu1  ;;  %v705_v47 = vadd.f32 %v3719_v44, %v4950_v2 }
 0x100   :  { %v4957_v7 = vadd.f32 %v3730_v1, %v1005_v4  ;;  %v4072_v8 = vpop.f32.mrb[9].mxu0 }
 0x102   :  { %4139 = vmatpush3.xpose.msk.msra.mxu0 %vm1362_vm2, %v4957_v7 }
 0x103   :  { %4148 = vmatprep.subr.mxu0 %v4546_v11 }
 0x105   :  { %4141 = vmatmul.mubr.msk.f32.vlgmr.msra.gmra.mrb[16].mxu0 %vm1362_vm2, %v352_v9 }
 0x106   :  { %v935_v13 = vpop.f32.mrb[10].mxu1  ;;  %4150 = vmatprep.mubr.msk.f32.mxu0 %vm4545_vm0, %v4546_v11 }
 0x107   :  { %v4974_v15 = vadd.f32 %v3729_v10, %v935_v13  ;;  %v1148_v16 = vpop.f32.mrb[10].mxu0  ;;  %v4061_v17 = vpop.f32.mrb[11].mxu1 }
 0x108   :  { %v4979_v19 = vadd.f32 %v3732_v12, %v1148_v16  ;;  %v4094_v20 = vpop.f32.mrb[11].mxu0 }
 0x109   :  { %4134 = vmatpush3.xpose.msk.msra.mxu1 %vm1362_vm2, %v4974_v15 }
 0x10a   :  { %4149 = vmatpush3.xpose.msk.msra.mxu0 %vm1362_vm2, %v4979_v19  ;;  %4143 = vmatprep.subr.mxu1 %v4546_v11 }
 0x10b   :  { %4158 = vmatprep.subr.mxu0 %v4546_v11 }
 0x10c   :  { %4136 = vmatmul.mubr.msk.f32.vlgmr.msra.gmra.mrb[18].mxu1 %vm1362_vm2, %v282_v21 }
 0x10d   :  { %4151 = vmatmul.mubr.msk.f32.vlgmr.msra.gmra.mrb[18].mxu0 %vm1362_vm2, %v495_v22  ;;  %4145 = vmatprep.mubr.msk.f32.mxu1 %vm4545_vm0, %v4546_v11 }
 0x10e   :  { %v1075_v25 = vpop.f32.mrb[12].mxu1  ;;  %4160 = vmatprep.mubr.msk.f32.mxu0 %vm4545_vm0, %v4546_v11 }
 0x10f   :  { %v5002_v27 = vadd.f32 %v3731_v23, %v1075_v25  ;;  %v1288_v28 = vpop.f32.mrb[12].mxu0  ;;  %v4083_v29 = vpop.f32.mrb[13].mxu1 }
 0x110   :  { %v5007_v32 = vadd.f32 %v3734_v24, %v1288_v28  ;;  %v4116_v33 = vpop.f32.mrb[13].mxu0 }
 0x111   :  { %4144 = vmatpush3.xpose.msk.msra.mxu1 %vm1362_vm2, %v5002_v27 }
 0x112   :  { %4159 = vmatpush3.xpose.msk.msra.mxu0 %vm1362_vm2, %v5007_v32  ;;  %4153 = vmatprep.subr.mxu1 %v4546_v11 }
 0x113   :  { %4168 = vmatprep.subr.mxu0 %v4546_v11 }
 0x114   :  { %4146 = vmatmul.mubr.msk.f32.vlgmr.msra.gmra.mrb[20].mxu1 %vm1362_vm2, %v422_v34 }
 0x115   :  { %4161 = vmatmul.mubr.msk.f32.vlgmr.msra.gmra.mrb[20].mxu0 %vm1362_vm2, %v635_v35  ;;  %4155 = vmatprep.mubr.msk.f32.mxu1 %vm4545_vm0, %v4546_v11 }
 0x116   :  { %v1218_v37 = vpop.f32.mrb[14].mxu1  ;;  %4170 = vmatprep.mubr.msk.f32.mxu0 %vm4545_vm0, %v4546_v11 }
 0x117   :  { %v1219_v39 = vadd.f32 %v3733_v36, %v1218_v37  ;;  %v4105_v40 = vpop.f32.mrb[15].mxu1 }
 0x119   :  { %4154 = vmatpush3.xpose.msk.msra.mxu1 %vm1362_vm2, %v1219_v39 }
 0x11a   :  { %4163 = vmatprep.subr.mxu1 %v4546_v11 }
 0x11c   :  { %4156 = vmatmul.mubr.msk.f32.vlgmr.msra.gmra.mrb[22].mxu1 %vm1362_vm2, %v565_v41 }
 0x11d   :  { %4165 = vmatprep.mubr.msk.f32.mxu1 %vm4545_vm0, %v4546_v11 }
 0x11e   :  { %v1358_v43 = vpop.f32.mrb[16].mxu1 }
 0x11f   :  { %v5039_v45 = vadd.f32 %v3735_v42, %v1358_v43  ;;  %v4127_v46 = vpop.f32.mrb[17].mxu1 }
 0x121   :  { %4164 = vmatpush3.xpose.msk.msra.mxu1 %vm1362_vm2, %v5039_v45 }
 0x122   :  { %4173 = vmatprep.subr.mxu1 %v4546_v11 }
 0x124   :  { %4166 = vmatmul.mubr.msk.f32.vlgmr.msra.gmra.mrb[24].mxu1 %vm1362_vm2, %v705_v47 }
 0x125   :  { %4175 = vmatprep.mubr.msk.f32.mxu1 %vm4545_vm0, %v4546_v11 }
 0x1d0   :  { %v1435_v48 = vpop.f32.mrb[14].mxu0 }
 0x1d1   :  { %v4132_v49 = vpop.f32.mrb[15].mxu0  ;;  %v1971_v50 = vsel %vm1362_vm2, %v1435_v48, -inf }
 0x1d2   :  { %1972 = vmax.xlane.f32.xlu0 %v1971_v50 }
 0x1d8   :  { %v1587_v51 = vpop.f32.mrb[16].mxu0 }
 0x1d9   :  { %v4142_v52 = vpop.f32.mrb[17].mxu0  ;;  %v1977_v53 = vsel %vm1362_vm2, %v1587_v51, -inf }
 0x1da   :  { %1978 = vmax.xlane.f32.xlu1 %v1977_v53 }
 0x1df   :  { %v1511_v54 = vpop.f32.mrb[18].mxu1 }
 0x1e0   :  { %v1739_v55 = vpop.f32.mrb[18].mxu0  ;;  %v4137_v56 = vpop.f32.mrb[19].mxu1  ;;  %v1974_v57 = vsel %vm1362_vm2, %v1511_v54, -inf }
 0x1e1   :  { %v4152_v58 = vpop.f32.mrb[19].mxu0  ;;  %1975 = vmax.xlane.f32.xlu0 %v1974_v57  ;;  %v1983_v59 = vsel %vm1362_vm2, %v1739_v55, -inf }
 0x1e5   :  { %1984 = vmax.xlane.f32.xlu0 %v1983_v59 }
 0x1e7   :  { %v1663_v60 = vpop.f32.mrb[20].mxu1 }
 0x1e8   :  { %v1891_v61 = vpop.f32.mrb[20].mxu0  ;;  %v4147_v63 = vpop.f32.mrb[21].mxu1  ;;  %v1980_v0 = vsel %vm1362_vm2, %v1663_v60, -inf }
 0x1e9   :  { %v4162_v1 = vpop.f32.mrb[21].mxu0  ;;  %v1989_v2 = vsel %vm1362_vm2, %v1891_v61, -inf  ;;  %1981 = vmax.xlane.f32.xlu1 %v1980_v0 }
 0x1ea   :  { %1990 = vmax.xlane.f32.xlu0 %v1989_v2 }
 0x1ef   :  { %v1815_v4 = vpop.f32.mrb[22].mxu1 }
 0x1f0   :  { %v4157_v5 = vpop.f32.mrb[23].mxu1  ;;  %v1986_v6 = vsel %vm1362_vm2, %v1815_v4, -inf }
 0x1f1   :  { %1987 = vmax.xlane.f32.xlu1 %v1986_v6 }
 0x1f7   :  { %v1967_v8 = vpop.f32.mrb[24].mxu1 }
 0x1f8   :  { %v4167_v9 = vpop.f32.mrb[25].mxu1  ;;  %v1992_v10 = vsel %vm1362_vm2, %v1967_v8, -inf }
 0x1f9   :  { %1993 = vmax.xlane.f32.xlu1 %v1992_v10 }
 0x200   :  { %2059 = vrot.lane.b32.xlu0 %v4941_v62, %s4547_s4 }
 0x204   :  { %2363 = vrot.lane.b32.xlu0 %v4979_v19, %s4547_s4 }
 0x20a   :  { %2135 = vrot.lane.b32.xlu1 %v4974_v15, %s4547_s4 }
 0x20e   :  { %2211 = vrot.lane.b32.xlu1 %v4957_v7, %s4547_s4 }
 0x212   :  { %2287 = vrot.lane.b32.xlu1 %v5002_v27, %s4547_s4 }
 0x216   :  { %2439 = vrot.lane.b32.xlu1 %v1219_v39, %s4547_s4 }
 0x25f   :  { %v1973_v12 = vpop.xlane.xlu0 %1972 }
 0x260   :  { %v1995_v13 = vsub.f32 %v1435_v48, %v1973_v12 }
 0x262   :  { %v2003_v14 = vmul.f32 1.442695, %v1995_v13 }
 0x264   :  { %4475 = vpow2.f32 %v2003_v14 }
 0x267   :  { %v1979_v16 = vpop.xlane.xlu1 %1978 }
 0x268   :  { %v1997_v62 = vsub.f32 %v1587_v51, %v1979_v16 }
 0x26a   :  { %v2007_v17 = vmul.f32 1.442695, %v1997_v62 }
 0x26c   :  { %4477 = vpow2.f32 %v2007_v17 }
 0x26e   :  { %v5067_v18 = vpop.eup %4475  ;;  %v1976_v19 = vpop.xlane.xlu0 %1975 }
 0x26f   :  { %v1996_v15 = vsub.f32 %v1511_v54, %v1976_v19  ;;  %v2019_v7 = vsel %vm1362_vm2, %v5067_v18, 0.0 }
 0x270   :  { %2020 = vadd.xlane.f32.xlu0 %v2019_v7 }
 0x271   :  { %v2005_v20 = vmul.f32 1.442695, %v1996_v15 }
 0x272   :  { %v1985_v21 = vpop.xlane.xlu0 %1984 }
 0x273   :  { %4479 = vpow2.f32 %v2005_v20  ;;  %v1999_v22 = vsub.f32 %v1739_v55, %v1985_v21  ;;  %v2667_v21 = vld [vmem:[%s5321_s7] sm:$0xff] }
 0x275   :  { %v2011_v23 = vmul.f32 1.442695, %v1999_v22  ;;  %v2668_v22 = vld [vmem:[%s5321_s7 + $0x8] sm:$0xff] }
 0x276   :  { %v5071_v24 = vpop.eup %4477  ;;  %v1982_v25 = vpop.xlane.xlu1 %1981 }
 0x277   :  { %4481 = vpow2.f32 %v2011_v23  ;;  %v1991_v26 = vpop.xlane.xlu0 %1990  ;;  %v1998_v27 = vsub.f32 %v1663_v60, %v1982_v25  ;;  %v2025_v28 = vsel %vm1362_vm2, %v5071_v24, 0.0  ;;  %v2669_v23 = vld [vmem:[%s5321_s7 + $0x10] sm:$0xff] }
 0x278   :  { %v2001_v29 = vsub.f32 %v1891_v61, %v1991_v26  ;;  %2026 = vadd.xlane.f32.xlu0 %v2025_v28  ;;  %v2671_v26 = vld [vmem:[%s5321_s7 + $0x20] sm:$0xff] }
 0x279   :  { %v2009_v30 = vmul.f32 1.442695, %v1998_v27 }
 0x27a   :  { %v2015_v33 = vmul.f32 1.442695, %v2001_v29  ;;  %v2670_v29 = vld [vmem:[%s5321_s7 + $0x18] sm:$0xff] }
 0x27b   :  { %4483 = vpow2.f32 %v2009_v30  ;;  %v2060_v34 = vpop.permute.xlu0 %2059 }
 0x27c   :  { %4485 = vpow2.f32 %v2015_v33  ;;  %4169 = vmatpush3.msra.mxu0 %v2060_v34  ;;  %v2673_v34 = vld [vmem:[%s5321_s7 + $0x30] sm:$0xff] }
 0x27d   :  { %v4480_v35 = vpop.eup %4479  ;;  %4178 = vmatprep.subr.mxu0 %v4546_v11 }
 0x27e   :  { %v1988_v36 = vpop.xlane.xlu1 %1987  ;;  %v2022_v37 = vsel %vm1362_vm2, %v4480_v35, 0.0 }
 0x27f   :  { %v2000_v38 = vsub.f32 %v1815_v4, %v1988_v36  ;;  %2023 = vadd.xlane.f32.xlu1 %v2022_v37  ;;  %v2364_v55 = vpop.permute.xlu0 %2363  ;;  %v2672_v37 = vld [vmem:[%s5321_s7 + $0x28] sm:$0xff] }
 0x281   :  { %v4482_v39 = vpop.eup %4481  ;;  %v2013_v40 = vmul.f32 1.442695, %v2000_v38 }
 0x282   :  { %v2031_v41 = vsel %vm1362_vm2, %v4482_v39, 0.0 }
 0x283   :  { %4487 = vpow2.f32 %v2013_v40  ;;  %2032 = vadd.xlane.f32.xlu0 %v2031_v41 }
 0x285   :  { %v5078_v42 = vpop.eup %4483 }
 0x286   :  { %v5080_v43 = vpop.eup %4485  ;;  %v1994_v44 = vpop.xlane.xlu1 %1993  ;;  %v2028_v46 = vsel %vm1362_vm2, %v5078_v42, 0.0 }
 0x287   :  { %v2002_v47 = vsub.f32 %v1967_v8, %v1994_v44  ;;  %v2037_v48 = vsel %vm1362_vm2, %v5080_v43, 0.0  ;;  %2029 = vadd.xlane.f32.xlu1 %v2028_v46 }
 0x288   :  { %2038 = vadd.xlane.f32.xlu0 %v2037_v48 }
 0x289   :  { %v2017_v49 = vmul.f32 1.442695, %v2002_v47 }
 0x28a   :  { %v2136_v50 = vpop.permute.xlu1 %2135 }
 0x28b   :  { %4489 = vpow2.f32 %v2017_v49  ;;  %4174 = vmatpush3.msra.mxu1 %v2136_v50 }
 0x28c   :  { %4183 = vmatprep.subr.mxu1 %v4546_v11 }
 0x28d   :  { %v5087_v51 = vpop.eup %4487 }
 0x28e   :  { %v2034_v52 = vsel %vm1362_vm2, %v5087_v51, 0.0  ;;  %v2212_v56 = vpop.permute.xlu1 %2211 }
 0x28f   :  { %2035 = vadd.xlane.f32.xlu1 %v2034_v52 }
 0x292   :  { %v2288_v58 = vpop.permute.xlu1 %2287 }
 0x295   :  { %v5091_v53 = vpop.eup %4489 }
 0x296   :  { %v2040_v54 = vsel %vm1362_vm2, %v5091_v53, 0.0  ;;  %v2440_v61 = vpop.permute.xlu1 %2439 }
 0x297   :  { %2041 = vadd.xlane.f32.xlu1 %v2040_v54 }
 0x29e   :  { %2515 = vrot.lane.b32.xlu0 %v5007_v32, %s4547_s4 }
 0x2a8   :  { %2591 = vrot.lane.b32.xlu1 %v5039_v45, %s4547_s4 }
 0x2fd   :  { %v2021_v57 = vpop.xlane.xlu0 %2020 }
 0x2fe   :  { %4491 = vrcp.f32 %v2021_v57 }
 0x305   :  { %v2027_v59 = vpop.xlane.xlu0 %2026 }
 0x306   :  { %4493 = vrcp.f32 %v2027_v59 }
 0x308   :  { %v4492_v60 = vpop.eup %4491 }
 0x309   :  { %v2051_v63 = vmul.f32 %v4492_v60, %v5067_v18 }
 0x30b   :  { %4171 = vmatmul.mubr.msk.f32.vlgmr.msra.gmra.mrb[22].mxu0 %vm1362_vm2, %v2051_v63 }
 0x30c   :  { %4179 = vmatpush3.msra.mxu0 %v2212_v56  ;;  %v2024_v0 = vpop.xlane.xlu1 %2023  ;;  %4180 = vmatprep.mubr.msk.f32.mxu0 %vm4545_vm0, %v4546_v11 }
 0x30d   :  { %4495 = vrcp.f32 %v2024_v0  ;;  %4188 = vmatprep.subr.mxu0 %v4546_v11  ;;  %v3776_v0 = vld [vmem:[%s5325_s11] ss:$0 sm:$0xff] }
 0x310   :  { %v4494_v32 = vpop.eup %4493  ;;  %v2033_v45 = vpop.xlane.xlu0 %2032 }
 0x311   :  { %v2053_v1 = vmul.f32 %v4494_v32, %v5071_v24  ;;  %4497 = vrcp.f32 %v2033_v45  ;;  %v4519_v32 = vld [vmem:[%s5314_s0] sm:$0xff] }
 0x313   :  { %4181 = vmatmul.mubr.msk.f32.vlgmr.msra.gmra.mrb[24].mxu0 %vm1362_vm2, %v2053_v1 }
 0x314   :  { %4189 = vmatpush3.msra.mxu0 %v2364_v55  ;;  %v2030_v2 = vpop.xlane.xlu1 %2029  ;;  %4190 = vmatprep.mubr.msk.f32.mxu0 %vm4545_vm0, %v4546_v11 }
 0x315   :  { %v2039_v4 = vpop.xlane.xlu0 %2038  ;;  %4499 = vrcp.f32 %v2030_v2  ;;  %4198 = vmatprep.subr.mxu0 %v4546_v11 }
 0x316   :  { %4501 = vrcp.f32 %v2039_v4 }
 0x317   :  { %v4496_v5 = vpop.eup %4495 }
 0x318   :  { %v2052_v6 = vmul.f32 %v4496_v5, %v4480_v35 }
 0x319   :  { %v2516_v12 = vpop.permute.xlu0 %2515 }
 0x31a   :  { %4176 = vmatmul.mubr.msk.f32.vlgmr.msra.gmra.mrb[26].mxu1 %vm1362_vm2, %v2052_v6 }
 0x31b   :  { %v4498_v8 = vpop.eup %4497  ;;  %4184 = vmatpush3.msra.mxu1 %v2288_v58  ;;  %4185 = vmatprep.mubr.msk.f32.mxu1 %vm4545_vm0, %v4546_v11 }
 0x31c   :  { %v2055_v9 = vmul.f32 %v4498_v8, %v4482_v39  ;;  %v2036_v10 = vpop.xlane.xlu1 %2035  ;;  %4193 = vmatprep.subr.mxu1 %v4546_v11 }
 0x31d   :  { %4503 = vrcp.f32 %v2036_v10 }
 0x31e   :  { %4191 = vmatmul.mubr.msk.f32.vlgmr.msra.gmra.mrb[26].mxu0 %vm1362_vm2, %v2055_v9 }
 0x31f   :  { %v4500_v13 = vpop.eup %4499  ;;  %4199 = vmatpush3.msra.mxu0 %v2516_v12  ;;  %4200 = vmatprep.mubr.msk.f32.mxu0 %vm4545_vm0, %v4546_v11 }
 0x320   :  { %v4502_v14 = vpop.eup %4501  ;;  %v2054_v16 = vmul.f32 %v4500_v13, %v5078_v42  ;;  %4208 = vmatprep.subr.mxu0 %v4546_v11  ;;  %v2674_v42 = vld [vmem:[%s5321_s7 + $0x38] sm:$0xff] }
 0x321   :  { %v2057_v62 = vmul.f32 %v4502_v14, %v5080_v43 }
 0x322   :  { %4186 = vmatmul.mubr.msk.f32.vlgmr.msra.gmra.mrb[28].mxu1 %vm1362_vm2, %v2054_v16 }
 0x323   :  { %4194 = vmatpush3.msra.mxu1 %v2440_v61  ;;  %4201 = vmatmul.mubr.msk.f32.vlgmr.msra.gmra.mrb[28].mxu0 %vm1362_vm2, %v2057_v62 }
 0x324   :  { %v2042_v17 = vpop.xlane.xlu1 %2041  ;;  %4195 = vmatprep.mubr.msk.f32.mxu1 %vm4545_vm0, %v4546_v11  ;;  %4203 = vmatprep.subr.mxu1 %v4546_v11 }
 0x325   :  { %4505 = vrcp.f32 %v2042_v17  ;;  %4210 = vmatprep.mubr.msk.f32.mxu0 %vm4545_vm0, %v4546_v11  ;;  %4209 = vmatpush3.msra.mxu0 %v2667_v21 }
 0x326   :  { %4218 = vmatprep.subr.mxu0 %v4546_v11 }
 0x327   :  { %v4504_v18 = vpop.eup %4503 }
 0x328   :  { %v2056_v19 = vmul.f32 %v4504_v18, %v5087_v51  ;;  %v2592_v15 = vpop.permute.xlu1 %2591 }
 0x32a   :  { %4196 = vmatmul.mubr.msk.f32.vlgmr.msra.gmra.mrb[30].mxu1 %vm1362_vm2, %v2056_v19 }
 0x32b   :  { %4204 = vmatpush3.msra.mxu1 %v2592_v15  ;;  %4205 = vmatprep.mubr.msk.f32.mxu1 %vm4545_vm0, %v4546_v11 }
 0x32c   :  { %4213 = vmatprep.subr.mxu1 %v4546_v11 }
 0x32f   :  { %v4506_v7 = vpop.eup %4505 }
 0x330   :  { %v2058_v20 = vmul.f32 %v4506_v7, %v5091_v53 }
 0x332   :  { %4206 = vmatmul.mubr.msk.f32.vlgmr.msra.gmra.mrb[32].mxu1 %vm1362_vm2, %v2058_v20 }
 0x333   :  { %4215 = vmatprep.mubr.msk.f32.mxu1 %vm4545_vm0, %v4546_v11  ;;  %4214 = vmatpush3.msra.mxu1 %v2668_v22 }
 0x334   :  { %4223 = vmatprep.subr.mxu1 %v4546_v11 }
 0x3de   :  { %v2131_v24 = vpop.f32.mrb[22].mxu0 }
 0x3df   :  { %v4172_v25 = vpop.f32.mrb[23].mxu0  ;;  %4211 = vmatmul.mubr.msk.f32.vlgmr.msra.gmra.mrb[30].mxu0 %vm1362_vm2, %v2131_v24  ;;  %v3266_v24 = vld [vmem:[%s5322_s8 + $0x8] sm:$0xff] }
 0x3e0   :  { %4219 = vmatpush3.msra.mxu0 %v2669_v23  ;;  %4220 = vmatprep.mubr.msk.f32.mxu0 %vm4545_vm0, %v4546_v11 }
 0x3e1   :  { %4228 = vmatprep.subr.mxu0 %v4546_v11 }
 0x3e6   :  { %v2283_v27 = vpop.f32.mrb[24].mxu0 }
 0x3e7   :  { %v4182_v28 = vpop.f32.mrb[25].mxu0  ;;  %4221 = vmatmul.mubr.msk.f32.vlgmr.msra.gmra.mrb[32].mxu0 %vm1362_vm2, %v2283_v27  ;;  %v3268_v27 = vld [vmem:[%s5322_s8 + $0x18] sm:$0xff] }
 0x3e8   :  { %4229 = vmatpush3.msra.mxu0 %v2671_v26  ;;  %4230 = vmatprep.mubr.msk.f32.mxu0 %vm4545_vm0, %v4546_v11  ;;  %v3267_v26 = vld [vmem:[%s5322_s8 + $0x10] sm:$0xff] }
 0x3e9   :  { %4238 = vmatprep.subr.mxu0 %v4546_v11  ;;  %v4424_v28 = vpack.c.bf16 %v3268_v27, %v3267_v26 }
 0x3ed   :  { %v2207_v30 = vpop.f32.mrb[26].mxu1 }
 0x3ee   :  { %v4177_v33 = vpop.f32.mrb[27].mxu1  ;;  %4216 = vmatmul.mubr.msk.f32.vlgmr.msra.gmra.mrb[34].mxu1 %vm1362_vm2, %v2207_v30  ;;  %v3271_v30 = vld [vmem:[%s5324_s10 + $0x8] sm:$0xff] }
 0x3ef   :  { %4224 = vmatpush3.msra.mxu1 %v2670_v29  ;;  %4225 = vmatprep.mubr.msk.f32.mxu1 %vm4545_vm0, %v4546_v11  ;;  %v3270_v29 = vld [vmem:[%s5324_s10] sm:$0xff] }
 0x3f0   :  { %4233 = vmatprep.subr.mxu1 %v4546_v11  ;;  %v4427_v33 = vpack.c.bf16 %v3271_v30, %v3270_v29 }
 0x3f1   :  { %v2435_v35 = vpop.f32.mrb[26].mxu0 }
 0x3f2   :  { %v4192_v36 = vpop.f32.mrb[27].mxu0  ;;  %4231 = vmatmul.mubr.msk.f32.vlgmr.msra.gmra.mrb[34].mxu0 %vm1362_vm2, %v2435_v35 }
 0x3f3   :  { %4239 = vmatpush3.msra.mxu0 %v2673_v34  ;;  %4240 = vmatprep.mubr.msk.f32.mxu0 %vm4545_vm0, %v4546_v11 }
 0x3f4   :  { %4420 = vmatprep.subr.bf16.mxu0 %v4544_v3 }
 0x3f5   :  { %v2359_v38 = vpop.f32.mrb[28].mxu1 }
 0x3f6   :  { %v2587_v39 = vpop.f32.mrb[28].mxu0  ;;  %v4187_v40 = vpop.f32.mrb[29].mxu1  ;;  %4226 = vmatmul.mubr.msk.f32.vlgmr.msra.gmra.mrb[36].mxu1 %vm1362_vm2, %v2359_v38  ;;  %v3777_v38 = vld [vmem:[%s5325_s11 + $0x1] ss:$0 sm:$0xff] }
 0x3f7   :  { %v4202_v41 = vpop.f32.mrb[29].mxu0  ;;  %4241 = vmatmul.mubr.msk.f32.vlgmr.msra.gmra.mrb[36].mxu0 %vm1362_vm2, %v2587_v39  ;;  %4234 = vmatpush3.msra.mxu1 %v2672_v37 }
 0x3f8   :  { %4235 = vmatprep.mubr.msk.f32.mxu1 %vm4545_vm0, %v4546_v11  ;;  %4243 = vmatprep.subr.mxu1 %v4546_v11 }
 0x3f9   :  { %4256 = vmatprep.mubr.msk.f32.mxu0 %vm4545_vm0, %v4546_v11 }
 0x3fd   :  { %v2511_v43 = vpop.f32.mrb[30].mxu1 }
 0x3fe   :  { %v4197_v44 = vpop.f32.mrb[31].mxu1  ;;  %4236 = vmatmul.mubr.msk.f32.vlgmr.msra.gmra.mrb[38].mxu1 %vm1362_vm2, %v2511_v43 }
 0x3ff   :  { %4244 = vmatpush3.msra.mxu1 %v2674_v42  ;;  %4245 = vmatprep.mubr.msk.f32.mxu1 %vm4545_vm0, %v4546_v11  ;;  %v3778_v42 = vld [vmem:[%s5325_s11 + $0x2] ss:$0 sm:$0xff] }
 0x400   :  { %4426 = vmatprep.subr.bf16.mxu1 %v4544_v3 }
 0x405   :  { %v2663_v46 = vpop.f32.mrb[32].mxu1 }
 0x406   :  { %v4207_v47 = vpop.f32.mrb[33].mxu1  ;;  %4246 = vmatmul.mubr.msk.f32.vlgmr.msra.gmra.mrb[40].mxu1 %vm1362_vm2, %v2663_v46 }
 0x407   :  { %4283 = vmatprep.mubr.msk.f32.mxu1 %vm4545_vm0, %v4546_v11  ;;  %4428 = vmatpush3.bf16.msra.mxu1 %v4427_v33 }
 0x408   :  { %4429 = vmatprep.subr.bf16.mxu1 %v4544_v3 }
 0x4b2   :  { %v2744_v48 = vpop.f32.mrb[30].mxu0 }
 0x4b3   :  { %v4212_v49 = vpop.f32.mrb[31].mxu0 }
 0x4ba   :  { %v2890_v50 = vpop.f32.mrb[32].mxu0 }
 0x4bb   :  { %v4222_v51 = vpop.f32.mrb[33].mxu0 }
 0x4bc   :  { %v3272_v51 = vld [vmem:[%s5324_s10 + $0x10] sm:$0xff] }
 0x4c1   :  { %v2817_v52 = vpop.f32.mrb[34].mxu1 }
 0x4c2   :  { %v3282_v53 = vadd.f32 %v2817_v52, %v2744_v48  ;;  %v4217_v54 = vpop.f32.mrb[35].mxu1  ;;  %v3273_v52 = vld [vmem:[%s5324_s10 + $0x18] sm:$0xff] }
 0x4c3   :  { %v3274_v54 = vld [vmem:[%s5324_s10 + $0x20] sm:$0xff] }
 0x4c4   :  { %v3283_v55 = vadd.f32 %v3282_v53, %v2890_v50  ;;  %v4430_v53 = vpack.c.bf16 %v3273_v52, %v3272_v51 }
 0x4c5   :  { %v3036_v56 = vpop.f32.mrb[34].mxu0 }
 0x4c6   :  { %v4232_v57 = vpop.f32.mrb[35].mxu0  ;;  %4431 = vmatpush3.bf16.msra.mxu1 %v4430_v53 }
 0x4c7   :  { %4432 = vmatprep.subr.bf16.mxu1 %v4544_v3  ;;  %v3277_v57 = vld [vmem:[%s5324_s10 + $0x38] sm:$0xff] }
 0x4c9   :  { %v2963_v58 = vpop.f32.mrb[36].mxu1 }
 0x4ca   :  { %v3284_v59 = vadd.f32 %v3283_v55, %v2963_v58  ;;  %v3182_v60 = vpop.f32.mrb[36].mxu0  ;;  %v4227_v61 = vpop.f32.mrb[37].mxu1 }
 0x4cb   :  { %v4242_v63 = vpop.f32.mrb[37].mxu0 }
 0x4cc   :  { %v3286_v45 = vadd.f32 %v4519_v32, %v3284_v59  ;;  %v3278_v59 = vld [vmem:[%s5324_s10 + $0x40] sm:$0xff]  ;;  %v3280_v63 = vld [vmem:[%s5324_s10 + $0x50] sm:$0xff] }
 0x4ce   :  { %v3291_v1 = vadd.f32 %v3776_v0, %v3286_v45  ;;  %v3779_v45 = vld [vmem:[%s5323_s9] ss:$0 sm:$0xff] }
 0x4d0   :  { %v3292_v2 = vsel %vm141_vm1, %v3291_v1, 0.0 }
 0x4d1   :  { %3293 = vadd.xlane.f32.xlu0 %v3292_v2  ;;  %v3109_v4 = vpop.f32.mrb[38].mxu1 }
 0x4d2   :  { %v3503_v5 = vadd.f32 %v3109_v4, %v3036_v56  ;;  %v4237_v6 = vpop.f32.mrb[39].mxu1  ;;  %v3276_v56 = vld [vmem:[%s5324_s10 + $0x30] sm:$0xff] }
 0x4d3   :  { %v4436_v58 = vpack.c.bf16 %v3277_v57, %v3276_v56 }
 0x4d4   :  { %v3504_v8 = vadd.f32 %v3503_v5, %v3182_v60  ;;  %v3279_v60 = vld [vmem:[%s5324_s10 + $0x48] sm:$0xff] }
 0x4d5   :  { %v4439_v61 = vpack.c.bf16 %v3279_v60, %v3278_v59 }
 0x4d9   :  { %v3255_v9 = vpop.f32.mrb[40].mxu1 }
 0x4da   :  { %v3505_v10 = vadd.f32 %v3504_v8, %v3255_v9  ;;  %v4247_v12 = vpop.f32.mrb[41].mxu1 }
 0x4dc   :  { %v3507_v13 = vadd.f32 %v4696_v31, %v3505_v10  ;;  %v3265_v31 = vld [vmem:[%s5322_s8] sm:$0xff] }
 0x4dd   :  { %v4421_v25 = vpack.c.bf16 %v3266_v24, %v3265_v31 }
 0x4de   :  { %v3508_v14 = vadd.f32 %v3776_v0, %v3507_v13  ;;  %v3281_v0 = vld [vmem:[%s5324_s10 + $0x58] sm:$0xff] }
 0x4df   :  { %4422 = vmatpush3.bf16.msra.mxu0 %v4421_v25  ;;  %v4442_v32 = vpack.c.bf16 %v3281_v0, %v3280_v63 }
 0x4e0   :  { %v3509_v16 = vsel %vm141_vm1, %v3508_v14, 0.0  ;;  %4423 = vmatprep.subr.bf16.mxu0 %v4544_v3 }
 0x4e1   :  { %3510 = vadd.xlane.f32.xlu1 %v3509_v16 }
 0x4e3   :  { %4425 = vmatpush3.bf16.msra.mxu0 %v4424_v28 }
 0x4e4   :  { %4444 = vmatprep.subr.bf16.mxu0 %v4544_v3 }
 0x55e   :  { %v3294_v62 = vpop.xlane.xlu0 %3293 }
 0x55f   :  { %v3296_v17 = vmul.f32 0.03125, %v3294_v62 }
 0x561   :  { %v3297_v18 = vsub.f32 %v3291_v1, %v3296_v17 }
 0x563   :  { %v3298_v19 = vmul.f32 %v3297_v18, %v3297_v18 }
 0x565   :  { %v3299_v15 = vsel %vm141_vm1, %v3298_v19, 0.0  ;;  %v3781_v19 = vld [vmem:[%s5325_s11 + $0x5] ss:$0 sm:$0xff] }
 0x566   :  { %3300 = vadd.xlane.f32.xlu0 %v3299_v15 }
 0x56e   :  { %v3511_v7 = vpop.xlane.xlu1 %3510 }
 0x56f   :  { %v3512_v20 = vmul.f32 0.03125, %v3511_v7 }
 0x571   :  { %v3513_v21 = vsub.f32 %v3508_v14, %v3512_v20 }
 0x573   :  { %v3514_v22 = vmul.f32 %v3513_v21, %v3513_v21 }
 0x575   :  { %v3515_v23 = vsel %vm141_vm1, %v3514_v22, 0.0 }
 0x576   :  { %3516 = vadd.xlane.f32.xlu0 %v3515_v23 }
 0x5f3   :  { %v3301_v34 = vpop.xlane.xlu0 %3300 }
 0x5f4   :  { %v3302_v35 = vmul.f32 0.03125, %v3301_v34 }
 0x5f6   :  { %v3303_v36 = vadd.f32 1e-05, %v3302_v35 }
 0x5f8   :  { %4507 = vrsqrt.f32 %v3303_v36 }
 0x602   :  { %v4508_v37 = vpop.eup %4507 }
 0x603   :  { %v3305_v39 = vmul.f32 %v4508_v37, %v3297_v18  ;;  %v3517_v40 = vpop.xlane.xlu0 %3516 }
 0x604   :  { %v3518_v41 = vmul.f32 0.03125, %v3517_v40 }
 0x605   :  { %v3310_v43 = vmul.f32 %v3777_v38, %v3305_v39 }
 0x606   :  { %v3519_v44 = vadd.f32 1e-05, %v3518_v41 }
 0x607   :  { %v5229_v46 = vadd.f32 %v3778_v42, %v3310_v43  ;;  %v3783_v43 = vld [vmem:[%s5325_s11 + $0x3] ss:$0 sm:$0xff] }
 0x608   :  { %4509 = vrsqrt.f32 %v3519_v44 }
 0x609   :  { %4257 = vmatmul.mubr.msk.f32.vlgmr.msra.gmra.mrb[38].mxu0 %vm141_vm1, %v5229_v46 }
 0x60a   :  { %4446 = vmatpush3.bf16.msra.mxu0 %v4421_v25  ;;  %4294 = vmatprep.mubr.msk.f32.mxu0 %vm4545_vm0, %v4546_v11 }
 0x60b   :  { %4447 = vmatprep.subr.bf16.mxu0 %v4544_v3 }
 0x60e   :  { %4449 = vmatpush3.bf16.msra.mxu0 %v4424_v28 }
 0x60f   :  { %4450 = vmatprep.subr.bf16.mxu0 %v4544_v3 }
 0x612   :  { %v4510_v47 = vpop.eup %4509 }
 0x613   :  { %v3521_v48 = vmul.f32 %v4510_v47, %v3513_v21 }
 0x615   :  { %v3522_v49 = vmul.f32 %v3777_v38, %v3521_v48  ;;  %v3784_v48 = vld [vmem:[%s5325_s11 + $0x4] ss:$0 sm:$0xff] }
 0x617   :  { %v5237_v50 = vadd.f32 %v3778_v42, %v3522_v49 }
 0x619   :  { %4295 = vmatmul.mubr.msk.f32.vlgmr.msra.gmra.mrb[40].mxu0 %vm141_vm1, %v5237_v50 }
 0x61a   :  { %4452 = vmatpush3.bf16.msra.mxu0 %v4427_v33  ;;  %4321 = vmatprep.mubr.msk.f32.mxu0 %vm4545_vm0, %v4546_v11  ;;  %v3275_v11 = vld [vmem:[%s5324_s10 + $0x28] sm:$0xff] }
 0x61b   :  { %4453 = vmatprep.subr.bf16.mxu0 %v4544_v3  ;;  %v4433_v55 = vpack.c.bf16 %v3275_v11, %v3274_v54 }
 0x61d   :  { %4434 = vmatpush3.bf16.msra.mxu1 %v4433_v55 }
 0x61e   :  { %4455 = vmatpush3.bf16.msra.mxu0 %v4430_v53  ;;  %4435 = vmatprep.subr.bf16.mxu1 %v4544_v3 }
 0x61f   :  { %4456 = vmatprep.subr.bf16.mxu0 %v4544_v3 }
 0x621   :  { %4437 = vmatpush3.bf16.msra.mxu1 %v4436_v58 }
 0x622   :  { %4458 = vmatpush3.bf16.msra.mxu0 %v4433_v55  ;;  %4438 = vmatprep.subr.bf16.mxu1 %v4544_v3 }
 0x623   :  { %4459 = vmatprep.subr.bf16.mxu0 %v4544_v3 }
 0x625   :  { %4440 = vmatpush3.bf16.msra.mxu1 %v4439_v61 }
 0x626   :  { %4461 = vmatpush3.bf16.msra.mxu0 %v4436_v58  ;;  %4441 = vmatprep.subr.bf16.mxu1 %v4544_v3 }
 0x627   :  { %4462 = vmatprep.subr.bf16.mxu0 %v4544_v3 }
 0x629   :  { %4443 = vmatpush3.bf16.msra.mxu1 %v4442_v32 }
 0x62a   :  { %4464 = vmatpush3.bf16.msra.mxu0 %v4439_v61 }
 0x62b   :  { %4465 = vmatprep.subr.bf16.mxu0 %v4544_v3 }
 0x62e   :  { %4467 = vmatpush3.bf16.msra.mxu0 %v4442_v32 }
 0x6dc   :  { %v3391_v1 = vpop.f32.mrb[38].mxu0 }
 0x6dd   :  { %v3392_v2 = vadd.f32 %v3779_v45, %v3391_v1  ;;  %v4258_v4 = vpop.f32.mrb[39].mxu0 }
 0x6df   :  { %v3396_v5 = vmul.f32 0.70710677, %v3392_v2  ;;  %v3395_v8 = vmul.f32 0.5, %v3392_v2 }
 0x6e1   :  { %4511 = verf.f32 %v3396_v5 }
 0x6eb   :  { %v4512_v6 = vpop.eup %4511 }
 0x6ec   :  { %v3398_v9 = vadd.f32 1.0, %v4512_v6  ;;  %v3593_v10 = vpop.f32.mrb[40].mxu0 }
 0x6ed   :  { %v3594_v12 = vadd.f32 %v3779_v45, %v3593_v10  ;;  %v4296_v13 = vpop.f32.mrb[41].mxu0 }
 0x6ee   :  { %v3399_v3 = vmul.f32 %v3398_v9, %v3395_v8 }
 0x6ef   :  { %v3598_v14 = vmul.f32 0.70710677, %v3594_v12  ;;  %v3597_v62 = vmul.f32 0.5, %v3594_v12 }
 0x6f0   :  { %4284 = vmatmul.mubr.msk.f32.vlgmr.msra.gmra.mrb[42].mxu1 %vm3404_vm3, %v3399_v3 }
 0x6f1   :  { %4513 = verf.f32 %v3598_v14 }
 0x6fb   :  { %v4514_v16 = vpop.eup %4513 }
 0x6fc   :  { %v3600_v17 = vadd.f32 1.0, %v4514_v16 }
 0x6fe   :  { %v3601_v18 = vmul.f32 %v3600_v17, %v3597_v62 }
 0x700   :  { %4322 = vmatmul.mubr.msk.f32.vlgmr.msra.gmra.mrb[42].mxu0 %vm3404_vm3, %v3601_v18 }
 0x7c3   :  { %v3474_v15 = vpop.f32.mrb[42].mxu1 }
 0x7c4   :  { %v3475_v7 = vadd.f32 %v3781_v19, %v3474_v15  ;;  %v4285_v20 = vpop.f32.mrb[43].mxu1 }
 0x7c6   :  { %v3478_v21 = vadd.f32 %v3475_v7, %v5229_v46 }
 0x7c8   :  { %v3479_v22 = vsel %vm141_vm1, %v3478_v21, 0.0 }
 0x7c9   :  { %3480 = vadd.xlane.f32.xlu0 %v3479_v22 }
 0x7d3   :  { %v3671_v23 = vpop.f32.mrb[42].mxu0 }
 0x7d4   :  { %v3672_v31 = vadd.f32 %v3781_v19, %v3671_v23  ;;  %v4323_v24 = vpop.f32.mrb[43].mxu0 }
 0x7d6   :  { %v3675_v25 = vadd.f32 %v3672_v31, %v5237_v50 }
 0x7d8   :  { %v3676_v26 = vsel %vm141_vm1, %v3675_v25, 0.0 }
 0x7d9   :  { %3677 = vadd.xlane.f32.xlu1 %v3676_v26 }
 0x856   :  { %v3481_v27 = vpop.xlane.xlu0 %3480 }
 0x857   :  { %v3482_v28 = vmul.f32 0.03125, %v3481_v27 }
 0x859   :  { %v3483_v29 = vsub.f32 %v3478_v21, %v3482_v28 }
 0x85b   :  { %v3484_v30 = vmul.f32 %v3483_v29, %v3483_v29 }
 0x85d   :  { %v3485_v33 = vsel %vm141_vm1, %v3484_v30, 0.0 }
 0x85e   :  { %3486 = vadd.xlane.f32.xlu0 %v3485_v33 }
 0x866   :  { %v3678_v34 = vpop.xlane.xlu1 %3677 }
 0x867   :  { %v3679_v35 = vmul.f32 0.03125, %v3678_v34 }
 0x869   :  { %v3680_v36 = vsub.f32 %v3675_v25, %v3679_v35 }
 0x86b   :  { %v3681_v37 = vmul.f32 %v3680_v36, %v3680_v36 }
 0x86d   :  { %v3682_v38 = vsel %vm141_vm1, %v3681_v37, 0.0 }
 0x86e   :  { %3683 = vadd.xlane.f32.xlu1 %v3682_v38 }
 0x8eb   :  { %v3487_v39 = vpop.xlane.xlu0 %3486 }
 0x8ec   :  { %v3488_v40 = vmul.f32 0.03125, %v3487_v39 }
 0x8ee   :  { %v3489_v41 = vadd.f32 1e-05, %v3488_v40 }
 0x8f0   :  { %4515 = vrsqrt.f32 %v3489_v41 }
 0x8fa   :  { %v4516_v42 = vpop.eup %4515 }
 0x8fb   :  { %v3491_v44 = vmul.f32 %v4516_v42, %v3483_v29  ;;  %v3684_v46 = vpop.xlane.xlu1 %3683 }
 0x8fc   :  { %v3685_v47 = vmul.f32 0.03125, %v3684_v46 }
 0x8fd   :  { %v3496_v49 = vmul.f32 %v3783_v43, %v3491_v44 }
 0x8fe   :  { %v3686_v50 = vadd.f32 1e-05, %v3685_v47 }
 0x8ff   :  { %v3501_v51 = vadd.f32 %v3784_v48, %v3496_v49 }
 0x900   :  { %4517 = vrsqrt.f32 %v3686_v50 }
 0x901   :  { %3502 = vst.msk [vmem:[#allocation2] sm:$0xff] %vm141_vm1, %v3501_v51 }
 0x90a   :  { %v4518_v52 = vpop.eup %4517 }
 0x90b   :  { %v3688_v53 = vmul.f32 %v4518_v52, %v3680_v36 }
 0x90d   :  { %v3689_v54 = vmul.f32 %v3783_v43, %v3688_v53 }
 0x90f   :  { %v3690_v11 = vadd.f32 %v3784_v48, %v3689_v54 }
 0x911   :  { %3692 = vst.msk [vmem:[#allocation2 + $0x8] sm:$0xff] %vm141_vm1, %v3690_v11 }
 0x912   :  { %4531 = shalt.err (!%p4528_p4)
}
 0x913   :  { %s4532_s25 = scalar_lea.hbm %s5326_s12, 256 }
 0x914   :  { %p4533_p5 = scmp.ne.s32.totalorder %s5326_s12, %s4532_s25  ;;  %p4536_p6 = scmp.lt.u32.totalorder %s4532_s25, %s5326_s12 }
 0x916   :  { %p4538_p7 = pnand %p4536_p6, %p4533_p5 }
 0x918   :  { %4541 = shalt.err (!%p4538_p7)
}
 0x919   :  { %s4549_s28 = smov 128   ;;  %s4550_s29 = smov 8  }
 0x91a   :  { %3704 = dma.vmem_to_hbm [thread:$0]  %s3699_s22, 256, %s5326_s12, [#allocation3], %s4549_s28, %s4549_s28, %s4550_s29  }
 0x91b   :  { %4542 = dma.done.wait [#allocation3], 256  }
 0x91c   :  { %4543 = vsyncadd [#allocation3], 4294967040 }
 0x91d   :  { %3708 = vsyncpa [#allocation3], 1 }

</bundles_post_ra>
